<compile_context>
chip_gen: v5e
topology: v5e:2x2
jax: 0.10.0
libtpu: 0.0.40
codegen_flags: <defaults>
</compile_context>

<pallas_src>
import functools

import jax
import jax.numpy as jnp
from jax.experimental import pallas as pl
from jax.experimental.pallas import tpu as pltpu  # noqa: F401

# --- model hyper-parameters (small, consistent with the module, scaled down) ---
D_MODEL = 32
N_HEADS = 4
HEAD_DIM = D_MODEL // N_HEADS
DIM_FF = 64
NUM_LAYERS = 2
EPS = 1e-6
BATCH = 2
SEQ = 8

# Rows of the packed per-layer "small vectors" array, shape (8, 3*D_MODEL).
ROW_LN1_G, ROW_LN1_B, ROW_LN2_G, ROW_LN2_B = 0, 1, 2, 3
ROW_BQKV, ROW_BO, ROW_B1, ROW_B2 = 4, 5, 6, 7

# Flip to jnp.bfloat16 on v6e/v7x (and for matmul inputs on v5e) to use the fast
# MXU path with f32 accumulation. Kept f32 here to match the PyTorch reference.
MM_DTYPE = jnp.float32


def _mm(a, b):
    return jnp.dot(a.astype(MM_DTYPE), b.astype(MM_DTYPE),
                   preferred_element_type=jnp.float32)


def _layernorm(x, gamma, beta):
    mean = jnp.mean(x, axis=-1, keepdims=True)
    var = jnp.mean((x - mean) ** 2, axis=-1, keepdims=True)
    return (x - mean) * jax.lax.rsqrt(var + EPS) * gamma + beta


def encoder_stack_kernel(x_ref, wqkv_ref, wo_ref, w1_ref, w2_ref, vec_ref,
                         fin_ref, o_ref, *, batch, seq, num_layers):
    """Full TransformerEncoder forward: num_layers pre-norm layers + final LN.

    x_ref / o_ref : (batch*seq, D_MODEL)
    wqkv_ref      : (L, D, 3D)   fused q/k/v projection weights, (in, out)
    wo_ref        : (L, D, D)
    w1_ref        : (L, D, DIM_FF)
    w2_ref        : (L, DIM_FF, D)
    vec_ref       : (L, 8, 3D)   packed LN params + biases (ROW_* constants)
    fin_ref       : (2, D)       final LayerNorm gamma / beta
    """
    n = batch * seq
    scale = 1.0 / (D_MODEL ** 0.5)      # reference divides by sqrt(d_model)
    x = x_ref[...]                      # (n, D)

    for layer in range(num_layers):     # static unroll (L = 2)
        wqkv = wqkv_ref[layer]          # (D, 3D)
        wo = wo_ref[layer]              # (D, D)
        w1 = w1_ref[layer]              # (D, F)
        w2 = w2_ref[layer]              # (F, D)
        vec = vec_ref[layer]            # (8, 3D)

        ln1_g = vec[ROW_LN1_G:ROW_LN1_G + 1, :D_MODEL]
        ln1_b = vec[ROW_LN1_B:ROW_LN1_B + 1, :D_MODEL]
        ln2_g = vec[ROW_LN2_G:ROW_LN2_G + 1, :D_MODEL]
        ln2_b = vec[ROW_LN2_B:ROW_LN2_B + 1, :D_MODEL]
        bqkv = vec[ROW_BQKV:ROW_BQKV + 1, :]
        bo = vec[ROW_BO:ROW_BO + 1, :D_MODEL]
        b1 = vec[ROW_B1:ROW_B1 + 1, :DIM_FF]
        b2 = vec[ROW_B2:ROW_B2 + 1, :D_MODEL]

        # ---- multi-head self-attention sub-layer (pre-norm) ----
        xn = _layernorm(x, ln1_g, ln1_b)
        qkv = _mm(xn, wqkv) + bqkv                                   # (n, 3D), one fused matmul
        q = qkv[:, 0 * D_MODEL:1 * D_MODEL].reshape(batch, seq, D_MODEL)
        k = qkv[:, 1 * D_MODEL:2 * D_MODEL].reshape(batch, seq, D_MODEL)
        v = qkv[:, 2 * D_MODEL:3 * D_MODEL].reshape(batch, seq, D_MODEL)

        # TODO(synk): e_mask (masked_fill(-inf)) path not implemented; mask=None only.
        attn = jnp.zeros((n, D_MODEL), jnp.float32)
        for h in range(N_HEADS):                                     # static unroll (H = 4)
            sl = slice(h * HEAD_DIM, (h + 1) * HEAD_DIM)
            qh, kh, vh = q[..., sl], k[..., sl], v[..., sl]          # (B, S, HD)
            s = jnp.einsum('bqd,bkd->bqk', qh, kh,
                           preferred_element_type=jnp.float32) * scale
            m = jnp.max(s, axis=-1, keepdims=True)
            p = jnp.exp(s - m)
            p = p * pl.reciprocal(jnp.sum(p, axis=-1, keepdims=True), approx=True)
            ctx = jnp.einsum('bqk,bkd->bqd', p, vh,
                             preferred_element_type=jnp.float32)     # (B, S, HD)
            # concat(ctx_h) @ Wo  ==  sum_h  ctx_h @ Wo[h*HD:(h+1)*HD, :]
            attn = attn + _mm(ctx.reshape(n, HEAD_DIM), wo[sl, :])
        h1 = x + (attn + bo)                                         # residual

        # ---- feed-forward sub-layer (pre-norm, ReLU) ----
        hn = _layernorm(h1, ln2_g, ln2_b)
        ff = jnp.maximum(_mm(hn, w1) + b1, 0.0)
        ff = _mm(ff, w2) + b2
        x = h1 + ff                                                  # residual

    fin = fin_ref[...]
    o_ref[...] = _layernorm(x, fin[0:1, :], fin[1:2, :])


@jax.jit
def transformer_encoder(x, wqkv, wo, w1, w2, vecs, fin):
    B, S, D = x.shape
    kernel = functools.partial(encoder_stack_kernel, batch=B, seq=S,
                               num_layers=wqkv.shape[0])
    out = pl.pallas_call(
        kernel,
        out_shape=jax.ShapeDtypeStruct((B * S, D), x.dtype),
    )(x.reshape(B * S, D), wqkv, wo, w1, w2, vecs, fin)
    return out.reshape(B, S, D)


def init_params(key):
    """Deterministic synthetic params, packed for the fused kernel."""
    wqkv_l, wo_l, w1_l, w2_l, vec_l = [], [], [], [], []

    def lin(kk, din, dout):
        return 0.02 * jax.random.normal(kk, (din, dout), jnp.float32)

    def bvec(kk, dout):
        return 0.02 * jax.random.normal(kk, (dout,), jnp.float32)

    for layer in range(NUM_LAYERS):
        ks = jax.random.split(jax.random.fold_in(key, layer), 10)
        wq, wk, wv = lin(ks[0], D_MODEL, D_MODEL), lin(ks[1], D_MODEL, D_MODEL), lin(ks[2], D_MODEL, D_MODEL)
        wqkv_l.append(jnp.concatenate([wq, wk, wv], axis=1))     # (D, 3D)
        wo_l.append(lin(ks[3], D_MODEL, D_MODEL))
        w1_l.append(lin(ks[4], D_MODEL, DIM_FF))
        w2_l.append(lin(ks[5], DIM_FF, D_MODEL))

        vec = jnp.zeros((8, 3 * D_MODEL), jnp.float32)
        vec = vec.at[ROW_LN1_G, :D_MODEL].set(1.0)               # LN gammas init to 1
        vec = vec.at[ROW_LN2_G, :D_MODEL].set(1.0)
        vec = vec.at[ROW_BQKV, :].set(bvec(ks[6], 3 * D_MODEL))  # concat(bq, bk, bv)
        vec = vec.at[ROW_BO, :D_MODEL].set(bvec(ks[7], D_MODEL))
        vec = vec.at[ROW_B1, :DIM_FF].set(bvec(ks[8], DIM_FF))
        vec = vec.at[ROW_B2, :D_MODEL].set(bvec(ks[9], D_MODEL))
        vec_l.append(vec)

    return (jnp.stack(wqkv_l), jnp.stack(wo_l), jnp.stack(w1_l),
            jnp.stack(w2_l), jnp.stack(vec_l))


def reference_forward(x, wqkv, wo, w1, w2, vecs, fin):
    """Pure-JAX mirror of the PyTorch TransformerEncoder forward (mask=None, eval)."""
    def ln(z, g, b):
        m = jnp.mean(z, axis=-1, keepdims=True)
        va = jnp.mean((z - m) ** 2, axis=-1, keepdims=True)
        return (z - m) / jnp.sqrt(va + EPS) * g + b

    B, S, D = x.shape
    out = x
    for layer in range(NUM_LAYERS):
        vec = vecs[layer]
        ln1_g, ln1_b = vec[ROW_LN1_G, :D], vec[ROW_LN1_B, :D]
        ln2_g, ln2_b = vec[ROW_LN2_G, :D], vec[ROW_LN2_B, :D]
        bqkv, bo = vec[ROW_BQKV], vec[ROW_BO, :D]
        b1, b2 = vec[ROW_B1, :DIM_FF], vec[ROW_B2, :D]

        xn = ln(out, ln1_g, ln1_b)
        qkv = xn @ wqkv[layer] + bqkv
        q, k, v = qkv[..., :D], qkv[..., D:2 * D], qkv[..., 2 * D:]
        q = jnp.transpose(q.reshape(B, S, N_HEADS, HEAD_DIM), (0, 2, 1, 3))
        k = jnp.transpose(k.reshape(B, S, N_HEADS, HEAD_DIM), (0, 2, 1, 3))
        v = jnp.transpose(v.reshape(B, S, N_HEADS, HEAD_DIM), (0, 2, 1, 3))
        sc = (q @ jnp.swapaxes(k, -2, -1)) / (D_MODEL ** 0.5)
        p = jax.nn.softmax(sc, axis=-1)
        ctx = jnp.transpose(p @ v, (0, 2, 1, 3)).reshape(B, S, D)
        mha = ctx @ wo[layer] + bo
        h1 = out + mha
        hn = ln(h1, ln2_g, ln2_b)
        ff = jnp.maximum(hn @ w1[layer] + b1, 0.0) @ w2[layer] + b2
        out = h1 + ff
    return ln(out, fin[0], fin[1])


if __name__ == "__main__":
    key = jax.random.PRNGKey(0)
    k_x, k_p = jax.random.split(key)

    x = jax.random.normal(k_x, (BATCH, SEQ, D_MODEL), jnp.float32)
    wqkv, wo, w1, w2, vecs = init_params(k_p)
    fin = jnp.stack([jnp.ones((D_MODEL,), jnp.float32),
                     jnp.zeros((D_MODEL,), jnp.float32)])      # final LN gamma/beta

    out = transformer_encoder(x, wqkv, wo, w1, w2, vecs, fin)
    jax.block_until_ready(out)

    assert out.shape == (BATCH, SEQ, D_MODEL)
    assert bool(jnp.all(jnp.isfinite(out)))

    ref = reference_forward(x, wqkv, wo, w1, w2, vecs, fin)
    assert bool(jnp.allclose(out, ref, atol=1e-2, rtol=1e-2)), \
        float(jnp.max(jnp.abs(out - ref)))

    print("KERNEL_OK")
</pallas_src>

<mosaic_0001>
module attributes {stable_mosaic.version = 11 : i64} {
  func.func @encoder_stack_kernel(%arg0: memref<16x32xf32, #tpu.memory_space<vmem>>, %arg1: memref<2x32x96xf32, #tpu.memory_space<vmem>>, %arg2: memref<2x32x32xf32, #tpu.memory_space<vmem>>, %arg3: memref<2x32x64xf32, #tpu.memory_space<vmem>>, %arg4: memref<2x64x32xf32, #tpu.memory_space<vmem>>, %arg5: memref<2x8x96xf32, #tpu.memory_space<vmem>>, %arg6: memref<2x32xf32, #tpu.memory_space<vmem>>, %arg7: memref<16x32xf32, #tpu.memory_space<vmem>>) attributes {dimension_semantics = [], scalar_prefetch = 0 : i64, scratch_operands = 0 : i64, tpu.core_type = #tpu.core_type<tc>} {
    %c0 = arith.constant 0 : index
    %c0_0 = arith.constant 0 : index
    %0 = vector.load %arg0[%c0, %c0_0] : memref<16x32xf32, #tpu.memory_space<vmem>>, vector<16x32xf32>
    %c0_1 = arith.constant 0 : index
    %c0_2 = arith.constant 0 : index
    %c0_3 = arith.constant 0 : index
    %1 = vector.load %arg1[%c0_1, %c0_2, %c0_3] : memref<2x32x96xf32, #tpu.memory_space<vmem>>, vector<1x32x96xf32>
    %2 = vector.shape_cast %1 : vector<1x32x96xf32> to vector<32x96xf32>
    %c0_4 = arith.constant 0 : index
    %c0_5 = arith.constant 0 : index
    %c0_6 = arith.constant 0 : index
    %3 = vector.load %arg2[%c0_4, %c0_5, %c0_6] : memref<2x32x32xf32, #tpu.memory_space<vmem>>, vector<1x32x32xf32>
    %4 = vector.shape_cast %3 : vector<1x32x32xf32> to vector<32x32xf32>
    %c0_7 = arith.constant 0 : index
    %c0_8 = arith.constant 0 : index
    %c0_9 = arith.constant 0 : index
    %5 = vector.load %arg3[%c0_7, %c0_8, %c0_9] : memref<2x32x64xf32, #tpu.memory_space<vmem>>, vector<1x32x64xf32>
    %6 = vector.shape_cast %5 : vector<1x32x64xf32> to vector<32x64xf32>
    %c0_10 = arith.constant 0 : index
    %c0_11 = arith.constant 0 : index
    %c0_12 = arith.constant 0 : index
    %7 = vector.load %arg4[%c0_10, %c0_11, %c0_12] : memref<2x64x32xf32, #tpu.memory_space<vmem>>, vector<1x64x32xf32>
    %8 = vector.shape_cast %7 : vector<1x64x32xf32> to vector<64x32xf32>
    %c0_13 = arith.constant 0 : index
    %c0_14 = arith.constant 0 : index
    %c0_15 = arith.constant 0 : index
    %9 = vector.load %arg5[%c0_13, %c0_14, %c0_15] : memref<2x8x96xf32, #tpu.memory_space<vmem>>, vector<1x8x96xf32>
    %10 = vector.shape_cast %9 : vector<1x8x96xf32> to vector<8x96xf32>
    %11 = vector.extract_strided_slice %10 {offsets = [0, 0], sizes = [1, 32], strides = [1, 1]} : vector<8x96xf32> to vector<1x32xf32>
    %12 = vector.extract_strided_slice %10 {offsets = [1, 0], sizes = [1, 32], strides = [1, 1]} : vector<8x96xf32> to vector<1x32xf32>
    %13 = vector.extract_strided_slice %10 {offsets = [2, 0], sizes = [1, 32], strides = [1, 1]} : vector<8x96xf32> to vector<1x32xf32>
    %14 = vector.extract_strided_slice %10 {offsets = [3, 0], sizes = [1, 32], strides = [1, 1]} : vector<8x96xf32> to vector<1x32xf32>
    %15 = vector.extract_strided_slice %10 {offsets = [4, 0], sizes = [1, 96], strides = [1, 1]} : vector<8x96xf32> to vector<1x96xf32>
    %16 = vector.extract_strided_slice %10 {offsets = [5, 0], sizes = [1, 32], strides = [1, 1]} : vector<8x96xf32> to vector<1x32xf32>
    %17 = vector.extract_strided_slice %10 {offsets = [6, 0], sizes = [1, 64], strides = [1, 1]} : vector<8x96xf32> to vector<1x64xf32>
    %18 = vector.extract_strided_slice %10 {offsets = [7, 0], sizes = [1, 32], strides = [1, 1]} : vector<8x96xf32> to vector<1x32xf32>
    %cst = arith.constant dense<0.000000e+00> : vector<16xf32>
    %19 = vector.multi_reduction <add>, %0, %cst [1] : vector<16x32xf32> to vector<16xf32>
    %20 = vector.shape_cast %19 : vector<16xf32> to vector<16x1xf32>
    %cst_16 = arith.constant 3.200000e+01 : f32
    %21 = vector.broadcast %cst_16 : f32 to vector<16x1xf32>
    %22 = arith.divf %20, %21 : vector<16x1xf32>
    %23 = vector.broadcast %22 : vector<16x1xf32> to vector<16x32xf32>
    %24 = arith.subf %0, %23 : vector<16x32xf32>
    %25 = arith.mulf %24, %24 : vector<16x32xf32>
    %cst_17 = arith.constant dense<0.000000e+00> : vector<16xf32>
    %26 = vector.multi_reduction <add>, %25, %cst_17 [1] : vector<16x32xf32> to vector<16xf32>
    %27 = vector.shape_cast %26 : vector<16xf32> to vector<16x1xf32>
    %cst_18 = arith.constant 3.200000e+01 : f32
    %28 = vector.broadcast %cst_18 : f32 to vector<16x1xf32>
    %29 = arith.divf %27, %28 : vector<16x1xf32>
    %30 = vector.broadcast %22 : vector<16x1xf32> to vector<16x32xf32>
    %31 = arith.subf %0, %30 : vector<16x32xf32>
    %cst_19 = arith.constant 9.99999997E-7 : f32
    %32 = vector.broadcast %cst_19 : f32 to vector<16x1xf32>
    %33 = arith.addf %29, %32 : vector<16x1xf32>
    %34 = math.rsqrt %33 : vector<16x1xf32>
    %35 = vector.broadcast %34 : vector<16x1xf32> to vector<16x32xf32>
    %36 = arith.mulf %31, %35 : vector<16x32xf32>
    %37 = vector.broadcast %11 : vector<1x32xf32> to vector<16x32xf32>
    %38 = arith.mulf %36, %37 : vector<16x32xf32>
    %39 = vector.broadcast %12 : vector<1x32xf32> to vector<16x32xf32>
    %40 = arith.addf %38, %39 : vector<16x32xf32>
    %cst_20 = arith.constant dense<0.000000e+00> : vector<16x96xf32>
    %41 = tpu.matmul %40, %2, %cst_20 {dimension_numbers = #tpu.dot_dimension_numbers<[1], [0], [0], [1], [0, 0, 1, 1], [], []>} : vector<16x32xf32>, vector<32x96xf32>, vector<16x96xf32> -> vector<16x96xf32>
    %42 = vector.broadcast %15 : vector<1x96xf32> to vector<16x96xf32>
    %43 = arith.addf %41, %42 : vector<16x96xf32>
    %44 = vector.extract_strided_slice %43 {offsets = [0, 0], sizes = [16, 32], strides = [1, 1]} : vector<16x96xf32> to vector<16x32xf32>
    %45 = vector.shape_cast %44 : vector<16x32xf32> to vector<2x8x32xf32>
    %46 = vector.extract_strided_slice %43 {offsets = [0, 32], sizes = [16, 32], strides = [1, 1]} : vector<16x96xf32> to vector<16x32xf32>
    %47 = vector.shape_cast %46 : vector<16x32xf32> to vector<2x8x32xf32>
    %48 = vector.extract_strided_slice %43 {offsets = [0, 64], sizes = [16, 32], strides = [1, 1]} : vector<16x96xf32> to vector<16x32xf32>
    %49 = vector.shape_cast %48 : vector<16x32xf32> to vector<2x8x32xf32>
    %cst_21 = arith.constant 0.000000e+00 : f32
    %50 = vector.broadcast %cst_21 : f32 to vector<16x32xf32>
    %51 = vector.extract_strided_slice %45 {offsets = [0, 0, 0], sizes = [2, 8, 8], strides = [1, 1, 1]} : vector<2x8x32xf32> to vector<2x8x8xf32>
    %52 = vector.extract_strided_slice %47 {offsets = [0, 0, 0], sizes = [2, 8, 8], strides = [1, 1, 1]} : vector<2x8x32xf32> to vector<2x8x8xf32>
    %53 = vector.extract_strided_slice %49 {offsets = [0, 0, 0], sizes = [2, 8, 8], strides = [1, 1, 1]} : vector<2x8x32xf32> to vector<2x8x8xf32>
    "tpu.trace_start"() <{level = 10 : i32, message = "bqd,bkd->bqk"}> : () -> ()
    %cst_22 = arith.constant dense<0.000000e+00> : vector<2x8x8xf32>
    %54 = tpu.matmul %51, %52, %cst_22 {dimension_numbers = #tpu.dot_dimension_numbers<[2], [2], [1], [1], [0, 0, 0, 1, 1, 1], [0], [0]>} : vector<2x8x8xf32>, vector<2x8x8xf32>, vector<2x8x8xf32> -> vector<2x8x8xf32>
    "tpu.trace_stop"() : () -> ()
    %cst_23 = arith.constant 0.176776692 : f32
    %55 = vector.broadcast %cst_23 : f32 to vector<2x8x8xf32>
    %56 = arith.mulf %54, %55 : vector<2x8x8xf32>
    %cst_24 = arith.constant dense<0xFF800000> : vector<2x8xf32>
    %57 = vector.multi_reduction <maximumf>, %56, %cst_24 [2] : vector<2x8x8xf32> to vector<2x8xf32>
    %58 = vector.shape_cast %57 : vector<2x8xf32> to vector<2x8x1xf32>
    %59 = vector.broadcast %58 : vector<2x8x1xf32> to vector<2x8x8xf32>
    %60 = arith.subf %56, %59 : vector<2x8x8xf32>
    %61 = math.exp %60 : vector<2x8x8xf32>
    %cst_25 = arith.constant dense<0.000000e+00> : vector<2x8xf32>
    %62 = vector.multi_reduction <add>, %61, %cst_25 [2] : vector<2x8x8xf32> to vector<2x8xf32>
    %63 = vector.shape_cast %62 : vector<2x8xf32> to vector<2x8x1xf32>
    %64 = tpu.reciprocal %63 {approx = true} : vector<2x8x1xf32> -> vector<2x8x1xf32>
    %65 = vector.broadcast %64 : vector<2x8x1xf32> to vector<2x8x8xf32>
    %66 = arith.mulf %61, %65 : vector<2x8x8xf32>
    "tpu.trace_start"() <{level = 10 : i32, message = "bqk,bkd->bqd"}> : () -> ()
    %cst_26 = arith.constant dense<0.000000e+00> : vector<2x8x8xf32>
    %67 = tpu.matmul %66, %53, %cst_26 {dimension_numbers = #tpu.dot_dimension_numbers<[2], [1], [1], [2], [0, 0, 0, 1, 1, 2], [0], [0]>} : vector<2x8x8xf32>, vector<2x8x8xf32>, vector<2x8x8xf32> -> vector<2x8x8xf32>
    "tpu.trace_stop"() : () -> ()
    %68 = vector.shape_cast %67 : vector<2x8x8xf32> to vector<16x8xf32>
    %69 = vector.extract_strided_slice %4 {offsets = [0, 0], sizes = [8, 32], strides = [1, 1]} : vector<32x32xf32> to vector<8x32xf32>
    %cst_27 = arith.constant dense<0.000000e+00> : vector<16x32xf32>
    %70 = tpu.matmul %68, %69, %cst_27 {dimension_numbers = #tpu.dot_dimension_numbers<[1], [0], [0], [1], [0, 0, 1, 1], [], []>} : vector<16x8xf32>, vector<8x32xf32>, vector<16x32xf32> -> vector<16x32xf32>
    %71 = arith.addf %50, %70 : vector<16x32xf32>
    %72 = vector.extract_strided_slice %45 {offsets = [0, 0, 8], sizes = [2, 8, 8], strides = [1, 1, 1]} : vector<2x8x32xf32> to vector<2x8x8xf32>
    %73 = vector.extract_strided_slice %47 {offsets = [0, 0, 8], sizes = [2, 8, 8], strides = [1, 1, 1]} : vector<2x8x32xf32> to vector<2x8x8xf32>
    %74 = vector.extract_strided_slice %49 {offsets = [0, 0, 8], sizes = [2, 8, 8], strides = [1, 1, 1]} : vector<2x8x32xf32> to vector<2x8x8xf32>
    "tpu.trace_start"() <{level = 10 : i32, message = "bqd,bkd->bqk"}> : () -> ()
    %cst_28 = arith.constant dense<0.000000e+00> : vector<2x8x8xf32>
    %75 = tpu.matmul %72, %73, %cst_28 {dimension_numbers = #tpu.dot_dimension_numbers<[2], [2], [1], [1], [0, 0, 0, 1, 1, 1], [0], [0]>} : vector<2x8x8xf32>, vector<2x8x8xf32>, vector<2x8x8xf32> -> vector<2x8x8xf32>
    "tpu.trace_stop"() : () -> ()
    %cst_29 = arith.constant 0.176776692 : f32
    %76 = vector.broadcast %cst_29 : f32 to vector<2x8x8xf32>
    %77 = arith.mulf %75, %76 : vector<2x8x8xf32>
    %cst_30 = arith.constant dense<0xFF800000> : vector<2x8xf32>
    %78 = vector.multi_reduction <maximumf>, %77, %cst_30 [2] : vector<2x8x8xf32> to vector<2x8xf32>
    %79 = vector.shape_cast %78 : vector<2x8xf32> to vector<2x8x1xf32>
    %80 = vector.broadcast %79 : vector<2x8x1xf32> to vector<2x8x8xf32>
    %81 = arith.subf %77, %80 : vector<2x8x8xf32>
    %82 = math.exp %81 : vector<2x8x8xf32>
    %cst_31 = arith.constant dense<0.000000e+00> : vector<2x8xf32>
    %83 = vector.multi_reduction <add>, %82, %cst_31 [2] : vector<2x8x8xf32> to vector<2x8xf32>
    %84 = vector.shape_cast %83 : vector<2x8xf32> to vector<2x8x1xf32>
    %85 = tpu.reciprocal %84 {approx = true} : vector<2x8x1xf32> -> vector<2x8x1xf32>
    %86 = vector.broadcast %85 : vector<2x8x1xf32> to vector<2x8x8xf32>
    %87 = arith.mulf %82, %86 : vector<2x8x8xf32>
    "tpu.trace_start"() <{level = 10 : i32, message = "bqk,bkd->bqd"}> : () -> ()
    %cst_32 = arith.constant dense<0.000000e+00> : vector<2x8x8xf32>
    %88 = tpu.matmul %87, %74, %cst_32 {dimension_numbers = #tpu.dot_dimension_numbers<[2], [1], [1], [2], [0, 0, 0, 1, 1, 2], [0], [0]>} : vector<2x8x8xf32>, vector<2x8x8xf32>, vector<2x8x8xf32> -> vector<2x8x8xf32>
    "tpu.trace_stop"() : () -> ()
    %89 = vector.shape_cast %88 : vector<2x8x8xf32> to vector<16x8xf32>
    %90 = vector.extract_strided_slice %4 {offsets = [8, 0], sizes = [8, 32], strides = [1, 1]} : vector<32x32xf32> to vector<8x32xf32>
    %cst_33 = arith.constant dense<0.000000e+00> : vector<16x32xf32>
    %91 = tpu.matmul %89, %90, %cst_33 {dimension_numbers = #tpu.dot_dimension_numbers<[1], [0], [0], [1], [0, 0, 1, 1], [], []>} : vector<16x8xf32>, vector<8x32xf32>, vector<16x32xf32> -> vector<16x32xf32>
    %92 = arith.addf %71, %91 : vector<16x32xf32>
    %93 = vector.extract_strided_slice %45 {offsets = [0, 0, 16], sizes = [2, 8, 8], strides = [1, 1, 1]} : vector<2x8x32xf32> to vector<2x8x8xf32>
    %94 = vector.extract_strided_slice %47 {offsets = [0, 0, 16], sizes = [2, 8, 8], strides = [1, 1, 1]} : vector<2x8x32xf32> to vector<2x8x8xf32>
    %95 = vector.extract_strided_slice %49 {offsets = [0, 0, 16], sizes = [2, 8, 8], strides = [1, 1, 1]} : vector<2x8x32xf32> to vector<2x8x8xf32>
    "tpu.trace_start"() <{level = 10 : i32, message = "bqd,bkd->bqk"}> : () -> ()
    %cst_34 = arith.constant dense<0.000000e+00> : vector<2x8x8xf32>
    %96 = tpu.matmul %93, %94, %cst_34 {dimension_numbers = #tpu.dot_dimension_numbers<[2], [2], [1], [1], [0, 0, 0, 1, 1, 1], [0], [0]>} : vector<2x8x8xf32>, vector<2x8x8xf32>, vector<2x8x8xf32> -> vector<2x8x8xf32>
    "tpu.trace_stop"() : () -> ()
    %cst_35 = arith.constant 0.176776692 : f32
    %97 = vector.broadcast %cst_35 : f32 to vector<2x8x8xf32>
    %98 = arith.mulf %96, %97 : vector<2x8x8xf32>
    %cst_36 = arith.constant dense<0xFF800000> : vector<2x8xf32>
    %99 = vector.multi_reduction <maximumf>, %98, %cst_36 [2] : vector<2x8x8xf32> to vector<2x8xf32>
    %100 = vector.shape_cast %99 : vector<2x8xf32> to vector<2x8x1xf32>
    %101 = vector.broadcast %100 : vector<2x8x1xf32> to vector<2x8x8xf32>
    %102 = arith.subf %98, %101 : vector<2x8x8xf32>
    %103 = math.exp %102 : vector<2x8x8xf32>
    %cst_37 = arith.constant dense<0.000000e+00> : vector<2x8xf32>
    %104 = vector.multi_reduction <add>, %103, %cst_37 [2] : vector<2x8x8xf32> to vector<2x8xf32>
    %105 = vector.shape_cast %104 : vector<2x8xf32> to vector<2x8x1xf32>
    %106 = tpu.reciprocal %105 {approx = true} : vector<2x8x1xf32> -> vector<2x8x1xf32>
    %107 = vector.broadcast %106 : vector<2x8x1xf32> to vector<2x8x8xf32>
    %108 = arith.mulf %103, %107 : vector<2x8x8xf32>
    "tpu.trace_start"() <{level = 10 : i32, message = "bqk,bkd->bqd"}> : () -> ()
    %cst_38 = arith.constant dense<0.000000e+00> : vector<2x8x8xf32>
    %109 = tpu.matmul %108, %95, %cst_38 {dimension_numbers = #tpu.dot_dimension_numbers<[2], [1], [1], [2], [0, 0, 0, 1, 1, 2], [0], [0]>} : vector<2x8x8xf32>, vector<2x8x8xf32>, vector<2x8x8xf32> -> vector<2x8x8xf32>
    "tpu.trace_stop"() : () -> ()
    %110 = vector.shape_cast %109 : vector<2x8x8xf32> to vector<16x8xf32>
    %111 = vector.extract_strided_slice %4 {offsets = [16, 0], sizes = [8, 32], strides = [1, 1]} : vector<32x32xf32> to vector<8x32xf32>
    %cst_39 = arith.constant dense<0.000000e+00> : vector<16x32xf32>
    %112 = tpu.matmul %110, %111, %cst_39 {dimension_numbers = #tpu.dot_dimension_numbers<[1], [0], [0], [1], [0, 0, 1, 1], [], []>} : vector<16x8xf32>, vector<8x32xf32>, vector<16x32xf32> -> vector<16x32xf32>
    %113 = arith.addf %92, %112 : vector<16x32xf32>
    %114 = vector.extract_strided_slice %45 {offsets = [0, 0, 24], sizes = [2, 8, 8], strides = [1, 1, 1]} : vector<2x8x32xf32> to vector<2x8x8xf32>
    %115 = vector.extract_strided_slice %47 {offsets = [0, 0, 24], sizes = [2, 8, 8], strides = [1, 1, 1]} : vector<2x8x32xf32> to vector<2x8x8xf32>
    %116 = vector.extract_strided_slice %49 {offsets = [0, 0, 24], sizes = [2, 8, 8], strides = [1, 1, 1]} : vector<2x8x32xf32> to vector<2x8x8xf32>
    "tpu.trace_start"() <{level = 10 : i32, message = "bqd,bkd->bqk"}> : () -> ()
    %cst_40 = arith.constant dense<0.000000e+00> : vector<2x8x8xf32>
    %117 = tpu.matmul %114, %115, %cst_40 {dimension_numbers = #tpu.dot_dimension_numbers<[2], [2], [1], [1], [0, 0, 0, 1, 1, 1], [0], [0]>} : vector<2x8x8xf32>, vector<2x8x8xf32>, vector<2x8x8xf32> -> vector<2x8x8xf32>
    "tpu.trace_stop"() : () -> ()
    %cst_41 = arith.constant 0.176776692 : f32
    %118 = vector.broadcast %cst_41 : f32 to vector<2x8x8xf32>
    %119 = arith.mulf %117, %118 : vector<2x8x8xf32>
    %cst_42 = arith.constant dense<0xFF800000> : vector<2x8xf32>
    %120 = vector.multi_reduction <maximumf>, %119, %cst_42 [2] : vector<2x8x8xf32> to vector<2x8xf32>
    %121 = vector.shape_cast %120 : vector<2x8xf32> to vector<2x8x1xf32>
    %122 = vector.broadcast %121 : vector<2x8x1xf32> to vector<2x8x8xf32>
    %123 = arith.subf %119, %122 : vector<2x8x8xf32>
    %124 = math.exp %123 : vector<2x8x8xf32>
    %cst_43 = arith.constant dense<0.000000e+00> : vector<2x8xf32>
    %125 = vector.multi_reduction <add>, %124, %cst_43 [2] : vector<2x8x8xf32> to vector<2x8xf32>
    %126 = vector.shape_cast %125 : vector<2x8xf32> to vector<2x8x1xf32>
    %127 = tpu.reciprocal %126 {approx = true} : vector<2x8x1xf32> -> vector<2x8x1xf32>
    %128 = vector.broadcast %127 : vector<2x8x1xf32> to vector<2x8x8xf32>
    %129 = arith.mulf %124, %128 : vector<2x8x8xf32>
    "tpu.trace_start"() <{level = 10 : i32, message = "bqk,bkd->bqd"}> : () -> ()
    %cst_44 = arith.constant dense<0.000000e+00> : vector<2x8x8xf32>
    %130 = tpu.matmul %129, %116, %cst_44 {dimension_numbers = #tpu.dot_dimension_numbers<[2], [1], [1], [2], [0, 0, 0, 1, 1, 2], [0], [0]>} : vector<2x8x8xf32>, vector<2x8x8xf32>, vector<2x8x8xf32> -> vector<2x8x8xf32>
    "tpu.trace_stop"() : () -> ()
    %131 = vector.shape_cast %130 : vector<2x8x8xf32> to vector<16x8xf32>
    %132 = vector.extract_strided_slice %4 {offsets = [24, 0], sizes = [8, 32], strides = [1, 1]} : vector<32x32xf32> to vector<8x32xf32>
    %cst_45 = arith.constant dense<0.000000e+00> : vector<16x32xf32>
    %133 = tpu.matmul %131, %132, %cst_45 {dimension_numbers = #tpu.dot_dimension_numbers<[1], [0], [0], [1], [0, 0, 1, 1], [], []>} : vector<16x8xf32>, vector<8x32xf32>, vector<16x32xf32> -> vector<16x32xf32>
    %134 = arith.addf %113, %133 : vector<16x32xf32>
    %135 = vector.broadcast %16 : vector<1x32xf32> to vector<16x32xf32>
    %136 = arith.addf %134, %135 : vector<16x32xf32>
    %137 = arith.addf %0, %136 : vector<16x32xf32>
    %cst_46 = arith.constant dense<0.000000e+00> : vector<16xf32>
    %138 = vector.multi_reduction <add>, %137, %cst_46 [1] : vector<16x32xf32> to vector<16xf32>
    %139 = vector.shape_cast %138 : vector<16xf32> to vector<16x1xf32>
    %cst_47 = arith.constant 3.200000e+01 : f32
    %140 = vector.broadcast %cst_47 : f32 to vector<16x1xf32>
    %141 = arith.divf %139, %140 : vector<16x1xf32>
    %142 = vector.broadcast %141 : vector<16x1xf32> to vector<16x32xf32>
    %143 = arith.subf %137, %142 : vector<16x32xf32>
    %144 = arith.mulf %143, %143 : vector<16x32xf32>
    %cst_48 = arith.constant dense<0.000000e+00> : vector<16xf32>
    %145 = vector.multi_reduction <add>, %144, %cst_48 [1] : vector<16x32xf32> to vector<16xf32>
    %146 = vector.shape_cast %145 : vector<16xf32> to vector<16x1xf32>
    %cst_49 = arith.constant 3.200000e+01 : f32
    %147 = vector.broadcast %cst_49 : f32 to vector<16x1xf32>
    %148 = arith.divf %146, %147 : vector<16x1xf32>
    %149 = vector.broadcast %141 : vector<16x1xf32> to vector<16x32xf32>
    %150 = arith.subf %137, %149 : vector<16x32xf32>
    %cst_50 = arith.constant 9.99999997E-7 : f32
    %151 = vector.broadcast %cst_50 : f32 to vector<16x1xf32>
    %152 = arith.addf %148, %151 : vector<16x1xf32>
    %153 = math.rsqrt %152 : vector<16x1xf32>
    %154 = vector.broadcast %153 : vector<16x1xf32> to vector<16x32xf32>
    %155 = arith.mulf %150, %154 : vector<16x32xf32>
    %156 = vector.broadcast %13 : vector<1x32xf32> to vector<16x32xf32>
    %157 = arith.mulf %155, %156 : vector<16x32xf32>
    %158 = vector.broadcast %14 : vector<1x32xf32> to vector<16x32xf32>
    %159 = arith.addf %157, %158 : vector<16x32xf32>
    %cst_51 = arith.constant dense<0.000000e+00> : vector<16x64xf32>
    %160 = tpu.matmul %159, %6, %cst_51 {dimension_numbers = #tpu.dot_dimension_numbers<[1], [0], [0], [1], [0, 0, 1, 1], [], []>} : vector<16x32xf32>, vector<32x64xf32>, vector<16x64xf32> -> vector<16x64xf32>
    %161 = vector.broadcast %17 : vector<1x64xf32> to vector<16x64xf32>
    %162 = arith.addf %160, %161 : vector<16x64xf32>
    %cst_52 = arith.constant 0.000000e+00 : f32
    %163 = vector.broadcast %cst_52 : f32 to vector<16x64xf32>
    %164 = arith.maximumf %162, %163 : vector<16x64xf32>
    %cst_53 = arith.constant dense<0.000000e+00> : vector<16x32xf32>
    %165 = tpu.matmul %164, %8, %cst_53 {dimension_numbers = #tpu.dot_dimension_numbers<[1], [0], [0], [1], [0, 0, 1, 1], [], []>} : vector<16x64xf32>, vector<64x32xf32>, vector<16x32xf32> -> vector<16x32xf32>
    %166 = vector.broadcast %18 : vector<1x32xf32> to vector<16x32xf32>
    %167 = arith.addf %165, %166 : vector<16x32xf32>
    %168 = arith.addf %137, %167 : vector<16x32xf32>
    %c1 = arith.constant 1 : index
    %c0_54 = arith.constant 0 : index
    %c0_55 = arith.constant 0 : index
    %169 = vector.load %arg1[%c1, %c0_54, %c0_55] : memref<2x32x96xf32, #tpu.memory_space<vmem>>, vector<1x32x96xf32>
    %170 = vector.shape_cast %169 : vector<1x32x96xf32> to vector<32x96xf32>
    %c1_56 = arith.constant 1 : index
    %c0_57 = arith.constant 0 : index
    %c0_58 = arith.constant 0 : index
    %171 = vector.load %arg2[%c1_56, %c0_57, %c0_58] : memref<2x32x32xf32, #tpu.memory_space<vmem>>, vector<1x32x32xf32>
    %172 = vector.shape_cast %171 : vector<1x32x32xf32> to vector<32x32xf32>
    %c1_59 = arith.constant 1 : index
    %c0_60 = arith.constant 0 : index
    %c0_61 = arith.constant 0 : index
    %173 = vector.load %arg3[%c1_59, %c0_60, %c0_61] : memref<2x32x64xf32, #tpu.memory_space<vmem>>, vector<1x32x64xf32>
    %174 = vector.shape_cast %173 : vector<1x32x64xf32> to vector<32x64xf32>
    %c1_62 = arith.constant 1 : index
    %c0_63 = arith.constant 0 : index
    %c0_64 = arith.constant 0 : index
    %175 = vector.load %arg4[%c1_62, %c0_63, %c0_64] : memref<2x64x32xf32, #tpu.memory_space<vmem>>, vector<1x64x32xf32>
    %176 = vector.shape_cast %175 : vector<1x64x32xf32> to vector<64x32xf32>
    %c1_65 = arith.constant 1 : index
    %c0_66 = arith.constant 0 : index
    %c0_67 = arith.constant 0 : index
    %177 = vector.load %arg5[%c1_65, %c0_66, %c0_67] : memref<2x8x96xf32, #tpu.memory_space<vmem>>, vector<1x8x96xf32>
    %178 = vector.shape_cast %177 : vector<1x8x96xf32> to vector<8x96xf32>
    %179 = vector.extract_strided_slice %178 {offsets = [0, 0], sizes = [1, 32], strides = [1, 1]} : vector<8x96xf32> to vector<1x32xf32>
    %180 = vector.extract_strided_slice %178 {offsets = [1, 0], sizes = [1, 32], strides = [1, 1]} : vector<8x96xf32> to vector<1x32xf32>
    %181 = vector.extract_strided_slice %178 {offsets = [2, 0], sizes = [1, 32], strides = [1, 1]} : vector<8x96xf32> to vector<1x32xf32>
    %182 = vector.extract_strided_slice %178 {offsets = [3, 0], sizes = [1, 32], strides = [1, 1]} : vector<8x96xf32> to vector<1x32xf32>
    %183 = vector.extract_strided_slice %178 {offsets = [4, 0], sizes = [1, 96], strides = [1, 1]} : vector<8x96xf32> to vector<1x96xf32>
    %184 = vector.extract_strided_slice %178 {offsets = [5, 0], sizes = [1, 32], strides = [1, 1]} : vector<8x96xf32> to vector<1x32xf32>
    %185 = vector.extract_strided_slice %178 {offsets = [6, 0], sizes = [1, 64], strides = [1, 1]} : vector<8x96xf32> to vector<1x64xf32>
    %186 = vector.extract_strided_slice %178 {offsets = [7, 0], sizes = [1, 32], strides = [1, 1]} : vector<8x96xf32> to vector<1x32xf32>
    %cst_68 = arith.constant dense<0.000000e+00> : vector<16xf32>
    %187 = vector.multi_reduction <add>, %168, %cst_68 [1] : vector<16x32xf32> to vector<16xf32>
    %188 = vector.shape_cast %187 : vector<16xf32> to vector<16x1xf32>
    %cst_69 = arith.constant 3.200000e+01 : f32
    %189 = vector.broadcast %cst_69 : f32 to vector<16x1xf32>
    %190 = arith.divf %188, %189 : vector<16x1xf32>
    %191 = vector.broadcast %190 : vector<16x1xf32> to vector<16x32xf32>
    %192 = arith.subf %168, %191 : vector<16x32xf32>
    %193 = arith.mulf %192, %192 : vector<16x32xf32>
    %cst_70 = arith.constant dense<0.000000e+00> : vector<16xf32>
    %194 = vector.multi_reduction <add>, %193, %cst_70 [1] : vector<16x32xf32> to vector<16xf32>
    %195 = vector.shape_cast %194 : vector<16xf32> to vector<16x1xf32>
    %cst_71 = arith.constant 3.200000e+01 : f32
    %196 = vector.broadcast %cst_71 : f32 to vector<16x1xf32>
    %197 = arith.divf %195, %196 : vector<16x1xf32>
    %198 = vector.broadcast %190 : vector<16x1xf32> to vector<16x32xf32>
    %199 = arith.subf %168, %198 : vector<16x32xf32>
    %cst_72 = arith.constant 9.99999997E-7 : f32
    %200 = vector.broadcast %cst_72 : f32 to vector<16x1xf32>
    %201 = arith.addf %197, %200 : vector<16x1xf32>
    %202 = math.rsqrt %201 : vector<16x1xf32>
    %203 = vector.broadcast %202 : vector<16x1xf32> to vector<16x32xf32>
    %204 = arith.mulf %199, %203 : vector<16x32xf32>
    %205 = vector.broadcast %179 : vector<1x32xf32> to vector<16x32xf32>
    %206 = arith.mulf %204, %205 : vector<16x32xf32>
    %207 = vector.broadcast %180 : vector<1x32xf32> to vector<16x32xf32>
    %208 = arith.addf %206, %207 : vector<16x32xf32>
    %cst_73 = arith.constant dense<0.000000e+00> : vector<16x96xf32>
    %209 = tpu.matmul %208, %170, %cst_73 {dimension_numbers = #tpu.dot_dimension_numbers<[1], [0], [0], [1], [0, 0, 1, 1], [], []>} : vector<16x32xf32>, vector<32x96xf32>, vector<16x96xf32> -> vector<16x96xf32>
    %210 = vector.broadcast %183 : vector<1x96xf32> to vector<16x96xf32>
    %211 = arith.addf %209, %210 : vector<16x96xf32>
    %212 = vector.extract_strided_slice %211 {offsets = [0, 0], sizes = [16, 32], strides = [1, 1]} : vector<16x96xf32> to vector<16x32xf32>
    %213 = vector.shape_cast %212 : vector<16x32xf32> to vector<2x8x32xf32>
    %214 = vector.extract_strided_slice %211 {offsets = [0, 32], sizes = [16, 32], strides = [1, 1]} : vector<16x96xf32> to vector<16x32xf32>
    %215 = vector.shape_cast %214 : vector<16x32xf32> to vector<2x8x32xf32>
    %216 = vector.extract_strided_slice %211 {offsets = [0, 64], sizes = [16, 32], strides = [1, 1]} : vector<16x96xf32> to vector<16x32xf32>
    %217 = vector.shape_cast %216 : vector<16x32xf32> to vector<2x8x32xf32>
    %cst_74 = arith.constant 0.000000e+00 : f32
    %218 = vector.broadcast %cst_74 : f32 to vector<16x32xf32>
    %219 = vector.extract_strided_slice %213 {offsets = [0, 0, 0], sizes = [2, 8, 8], strides = [1, 1, 1]} : vector<2x8x32xf32> to vector<2x8x8xf32>
    %220 = vector.extract_strided_slice %215 {offsets = [0, 0, 0], sizes = [2, 8, 8], strides = [1, 1, 1]} : vector<2x8x32xf32> to vector<2x8x8xf32>
    %221 = vector.extract_strided_slice %217 {offsets = [0, 0, 0], sizes = [2, 8, 8], strides = [1, 1, 1]} : vector<2x8x32xf32> to vector<2x8x8xf32>
    "tpu.trace_start"() <{level = 10 : i32, message = "bqd,bkd->bqk"}> : () -> ()
    %cst_75 = arith.constant dense<0.000000e+00> : vector<2x8x8xf32>
    %222 = tpu.matmul %219, %220, %cst_75 {dimension_numbers = #tpu.dot_dimension_numbers<[2], [2], [1], [1], [0, 0, 0, 1, 1, 1], [0], [0]>} : vector<2x8x8xf32>, vector<2x8x8xf32>, vector<2x8x8xf32> -> vector<2x8x8xf32>
    "tpu.trace_stop"() : () -> ()
    %cst_76 = arith.constant 0.176776692 : f32
    %223 = vector.broadcast %cst_76 : f32 to vector<2x8x8xf32>
    %224 = arith.mulf %222, %223 : vector<2x8x8xf32>
    %cst_77 = arith.constant dense<0xFF800000> : vector<2x8xf32>
    %225 = vector.multi_reduction <maximumf>, %224, %cst_77 [2] : vector<2x8x8xf32> to vector<2x8xf32>
    %226 = vector.shape_cast %225 : vector<2x8xf32> to vector<2x8x1xf32>
    %227 = vector.broadcast %226 : vector<2x8x1xf32> to vector<2x8x8xf32>
    %228 = arith.subf %224, %227 : vector<2x8x8xf32>
    %229 = math.exp %228 : vector<2x8x8xf32>
    %cst_78 = arith.constant dense<0.000000e+00> : vector<2x8xf32>
    %230 = vector.multi_reduction <add>, %229, %cst_78 [2] : vector<2x8x8xf32> to vector<2x8xf32>
    %231 = vector.shape_cast %230 : vector<2x8xf32> to vector<2x8x1xf32>
    %232 = tpu.reciprocal %231 {approx = true} : vector<2x8x1xf32> -> vector<2x8x1xf32>
    %233 = vector.broadcast %232 : vector<2x8x1xf32> to vector<2x8x8xf32>
    %234 = arith.mulf %229, %233 : vector<2x8x8xf32>
    "tpu.trace_start"() <{level = 10 : i32, message = "bqk,bkd->bqd"}> : () -> ()
    %cst_79 = arith.constant dense<0.000000e+00> : vector<2x8x8xf32>
    %235 = tpu.matmul %234, %221, %cst_79 {dimension_numbers = #tpu.dot_dimension_numbers<[2], [1], [1], [2], [0, 0, 0, 1, 1, 2], [0], [0]>} : vector<2x8x8xf32>, vector<2x8x8xf32>, vector<2x8x8xf32> -> vector<2x8x8xf32>
    "tpu.trace_stop"() : () -> ()
    %236 = vector.shape_cast %235 : vector<2x8x8xf32> to vector<16x8xf32>
    %237 = vector.extract_strided_slice %172 {offsets = [0, 0], sizes = [8, 32], strides = [1, 1]} : vector<32x32xf32> to vector<8x32xf32>
    %cst_80 = arith.constant dense<0.000000e+00> : vector<16x32xf32>
    %238 = tpu.matmul %236, %237, %cst_80 {dimension_numbers = #tpu.dot_dimension_numbers<[1], [0], [0], [1], [0, 0, 1, 1], [], []>} : vector<16x8xf32>, vector<8x32xf32>, vector<16x32xf32> -> vector<16x32xf32>
    %239 = arith.addf %218, %238 : vector<16x32xf32>
    %240 = vector.extract_strided_slice %213 {offsets = [0, 0, 8], sizes = [2, 8, 8], strides = [1, 1, 1]} : vector<2x8x32xf32> to vector<2x8x8xf32>
    %241 = vector.extract_strided_slice %215 {offsets = [0, 0, 8], sizes = [2, 8, 8], strides = [1, 1, 1]} : vector<2x8x32xf32> to vector<2x8x8xf32>
    %242 = vector.extract_strided_slice %217 {offsets = [0, 0, 8], sizes = [2, 8, 8], strides = [1, 1, 1]} : vector<2x8x32xf32> to vector<2x8x8xf32>
    "tpu.trace_start"() <{level = 10 : i32, message = "bqd,bkd->bqk"}> : () -> ()
    %cst_81 = arith.constant dense<0.000000e+00> : vector<2x8x8xf32>
    %243 = tpu.matmul %240, %241, %cst_81 {dimension_numbers = #tpu.dot_dimension_numbers<[2], [2], [1], [1], [0, 0, 0, 1, 1, 1], [0], [0]>} : vector<2x8x8xf32>, vector<2x8x8xf32>, vector<2x8x8xf32> -> vector<2x8x8xf32>
    "tpu.trace_stop"() : () -> ()
    %cst_82 = arith.constant 0.176776692 : f32
    %244 = vector.broadcast %cst_82 : f32 to vector<2x8x8xf32>
    %245 = arith.mulf %243, %244 : vector<2x8x8xf32>
    %cst_83 = arith.constant dense<0xFF800000> : vector<2x8xf32>
    %246 = vector.multi_reduction <maximumf>, %245, %cst_83 [2] : vector<2x8x8xf32> to vector<2x8xf32>
    %247 = vector.shape_cast %246 : vector<2x8xf32> to vector<2x8x1xf32>
    %248 = vector.broadcast %247 : vector<2x8x1xf32> to vector<2x8x8xf32>
    %249 = arith.subf %245, %248 : vector<2x8x8xf32>
    %250 = math.exp %249 : vector<2x8x8xf32>
    %cst_84 = arith.constant dense<0.000000e+00> : vector<2x8xf32>
    %251 = vector.multi_reduction <add>, %250, %cst_84 [2] : vector<2x8x8xf32> to vector<2x8xf32>
    %252 = vector.shape_cast %251 : vector<2x8xf32> to vector<2x8x1xf32>
    %253 = tpu.reciprocal %252 {approx = true} : vector<2x8x1xf32> -> vector<2x8x1xf32>
    %254 = vector.broadcast %253 : vector<2x8x1xf32> to vector<2x8x8xf32>
    %255 = arith.mulf %250, %254 : vector<2x8x8xf32>
    "tpu.trace_start"() <{level = 10 : i32, message = "bqk,bkd->bqd"}> : () -> ()
    %cst_85 = arith.constant dense<0.000000e+00> : vector<2x8x8xf32>
    %256 = tpu.matmul %255, %242, %cst_85 {dimension_numbers = #tpu.dot_dimension_numbers<[2], [1], [1], [2], [0, 0, 0, 1, 1, 2], [0], [0]>} : vector<2x8x8xf32>, vector<2x8x8xf32>, vector<2x8x8xf32> -> vector<2x8x8xf32>
    "tpu.trace_stop"() : () -> ()
    %257 = vector.shape_cast %256 : vector<2x8x8xf32> to vector<16x8xf32>
    %258 = vector.extract_strided_slice %172 {offsets = [8, 0], sizes = [8, 32], strides = [1, 1]} : vector<32x32xf32> to vector<8x32xf32>
    %cst_86 = arith.constant dense<0.000000e+00> : vector<16x32xf32>
    %259 = tpu.matmul %257, %258, %cst_86 {dimension_numbers = #tpu.dot_dimension_numbers<[1], [0], [0], [1], [0, 0, 1, 1], [], []>} : vector<16x8xf32>, vector<8x32xf32>, vector<16x32xf32> -> vector<16x32xf32>
    %260 = arith.addf %239, %259 : vector<16x32xf32>
    %261 = vector.extract_strided_slice %213 {offsets = [0, 0, 16], sizes = [2, 8, 8], strides = [1, 1, 1]} : vector<2x8x32xf32> to vector<2x8x8xf32>
    %262 = vector.extract_strided_slice %215 {offsets = [0, 0, 16], sizes = [2, 8, 8], strides = [1, 1, 1]} : vector<2x8x32xf32> to vector<2x8x8xf32>
    %263 = vector.extract_strided_slice %217 {offsets = [0, 0, 16], sizes = [2, 8, 8], strides = [1, 1, 1]} : vector<2x8x32xf32> to vector<2x8x8xf32>
    "tpu.trace_start"() <{level = 10 : i32, message = "bqd,bkd->bqk"}> : () -> ()
    %cst_87 = arith.constant dense<0.000000e+00> : vector<2x8x8xf32>
    %264 = tpu.matmul %261, %262, %cst_87 {dimension_numbers = #tpu.dot_dimension_numbers<[2], [2], [1], [1], [0, 0, 0, 1, 1, 1], [0], [0]>} : vector<2x8x8xf32>, vector<2x8x8xf32>, vector<2x8x8xf32> -> vector<2x8x8xf32>
    "tpu.trace_stop"() : () -> ()
    %cst_88 = arith.constant 0.176776692 : f32
    %265 = vector.broadcast %cst_88 : f32 to vector<2x8x8xf32>
    %266 = arith.mulf %264, %265 : vector<2x8x8xf32>
    %cst_89 = arith.constant dense<0xFF800000> : vector<2x8xf32>
    %267 = vector.multi_reduction <maximumf>, %266, %cst_89 [2] : vector<2x8x8xf32> to vector<2x8xf32>
    %268 = vector.shape_cast %267 : vector<2x8xf32> to vector<2x8x1xf32>
    %269 = vector.broadcast %268 : vector<2x8x1xf32> to vector<2x8x8xf32>
    %270 = arith.subf %266, %269 : vector<2x8x8xf32>
    %271 = math.exp %270 : vector<2x8x8xf32>
    %cst_90 = arith.constant dense<0.000000e+00> : vector<2x8xf32>
    %272 = vector.multi_reduction <add>, %271, %cst_90 [2] : vector<2x8x8xf32> to vector<2x8xf32>
    %273 = vector.shape_cast %272 : vector<2x8xf32> to vector<2x8x1xf32>
    %274 = tpu.reciprocal %273 {approx = true} : vector<2x8x1xf32> -> vector<2x8x1xf32>
    %275 = vector.broadcast %274 : vector<2x8x1xf32> to vector<2x8x8xf32>
    %276 = arith.mulf %271, %275 : vector<2x8x8xf32>
    "tpu.trace_start"() <{level = 10 : i32, message = "bqk,bkd->bqd"}> : () -> ()
    %cst_91 = arith.constant dense<0.000000e+00> : vector<2x8x8xf32>
    %277 = tpu.matmul %276, %263, %cst_91 {dimension_numbers = #tpu.dot_dimension_numbers<[2], [1], [1], [2], [0, 0, 0, 1, 1, 2], [0], [0]>} : vector<2x8x8xf32>, vector<2x8x8xf32>, vector<2x8x8xf32> -> vector<2x8x8xf32>
    "tpu.trace_stop"() : () -> ()
    %278 = vector.shape_cast %277 : vector<2x8x8xf32> to vector<16x8xf32>
    %279 = vector.extract_strided_slice %172 {offsets = [16, 0], sizes = [8, 32], strides = [1, 1]} : vector<32x32xf32> to vector<8x32xf32>
    %cst_92 = arith.constant dense<0.000000e+00> : vector<16x32xf32>
    %280 = tpu.matmul %278, %279, %cst_92 {dimension_numbers = #tpu.dot_dimension_numbers<[1], [0], [0], [1], [0, 0, 1, 1], [], []>} : vector<16x8xf32>, vector<8x32xf32>, vector<16x32xf32> -> vector<16x32xf32>
    %281 = arith.addf %260, %280 : vector<16x32xf32>
    %282 = vector.extract_strided_slice %213 {offsets = [0, 0, 24], sizes = [2, 8, 8], strides = [1, 1, 1]} : vector<2x8x32xf32> to vector<2x8x8xf32>
    %283 = vector.extract_strided_slice %215 {offsets = [0, 0, 24], sizes = [2, 8, 8], strides = [1, 1, 1]} : vector<2x8x32xf32> to vector<2x8x8xf32>
    %284 = vector.extract_strided_slice %217 {offsets = [0, 0, 24], sizes = [2, 8, 8], strides = [1, 1, 1]} : vector<2x8x32xf32> to vector<2x8x8xf32>
    "tpu.trace_start"() <{level = 10 : i32, message = "bqd,bkd->bqk"}> : () -> ()
    %cst_93 = arith.constant dense<0.000000e+00> : vector<2x8x8xf32>
    %285 = tpu.matmul %282, %283, %cst_93 {dimension_numbers = #tpu.dot_dimension_numbers<[2], [2], [1], [1], [0, 0, 0, 1, 1, 1], [0], [0]>} : vector<2x8x8xf32>, vector<2x8x8xf32>, vector<2x8x8xf32> -> vector<2x8x8xf32>
    "tpu.trace_stop"() : () -> ()
    %cst_94 = arith.constant 0.176776692 : f32
    %286 = vector.broadcast %cst_94 : f32 to vector<2x8x8xf32>
    %287 = arith.mulf %285, %286 : vector<2x8x8xf32>
    %cst_95 = arith.constant dense<0xFF800000> : vector<2x8xf32>
    %288 = vector.multi_reduction <maximumf>, %287, %cst_95 [2] : vector<2x8x8xf32> to vector<2x8xf32>
    %289 = vector.shape_cast %288 : vector<2x8xf32> to vector<2x8x1xf32>
    %290 = vector.broadcast %289 : vector<2x8x1xf32> to vector<2x8x8xf32>
    %291 = arith.subf %287, %290 : vector<2x8x8xf32>
    %292 = math.exp %291 : vector<2x8x8xf32>
    %cst_96 = arith.constant dense<0.000000e+00> : vector<2x8xf32>
    %293 = vector.multi_reduction <add>, %292, %cst_96 [2] : vector<2x8x8xf32> to vector<2x8xf32>
    %294 = vector.shape_cast %293 : vector<2x8xf32> to vector<2x8x1xf32>
    %295 = tpu.reciprocal %294 {approx = true} : vector<2x8x1xf32> -> vector<2x8x1xf32>
    %296 = vector.broadcast %295 : vector<2x8x1xf32> to vector<2x8x8xf32>
    %297 = arith.mulf %292, %296 : vector<2x8x8xf32>
    "tpu.trace_start"() <{level = 10 : i32, message = "bqk,bkd->bqd"}> : () -> ()
    %cst_97 = arith.constant dense<0.000000e+00> : vector<2x8x8xf32>
    %298 = tpu.matmul %297, %284, %cst_97 {dimension_numbers = #tpu.dot_dimension_numbers<[2], [1], [1], [2], [0, 0, 0, 1, 1, 2], [0], [0]>} : vector<2x8x8xf32>, vector<2x8x8xf32>, vector<2x8x8xf32> -> vector<2x8x8xf32>
    "tpu.trace_stop"() : () -> ()
    %299 = vector.shape_cast %298 : vector<2x8x8xf32> to vector<16x8xf32>
    %300 = vector.extract_strided_slice %172 {offsets = [24, 0], sizes = [8, 32], strides = [1, 1]} : vector<32x32xf32> to vector<8x32xf32>
    %cst_98 = arith.constant dense<0.000000e+00> : vector<16x32xf32>
    %301 = tpu.matmul %299, %300, %cst_98 {dimension_numbers = #tpu.dot_dimension_numbers<[1], [0], [0], [1], [0, 0, 1, 1], [], []>} : vector<16x8xf32>, vector<8x32xf32>, vector<16x32xf32> -> vector<16x32xf32>
    %302 = arith.addf %281, %301 : vector<16x32xf32>
    %303 = vector.broadcast %184 : vector<1x32xf32> to vector<16x32xf32>
    %304 = arith.addf %302, %303 : vector<16x32xf32>
    %305 = arith.addf %168, %304 : vector<16x32xf32>
    %cst_99 = arith.constant dense<0.000000e+00> : vector<16xf32>
    %306 = vector.multi_reduction <add>, %305, %cst_99 [1] : vector<16x32xf32> to vector<16xf32>
    %307 = vector.shape_cast %306 : vector<16xf32> to vector<16x1xf32>
    %cst_100 = arith.constant 3.200000e+01 : f32
    %308 = vector.broadcast %cst_100 : f32 to vector<16x1xf32>
    %309 = arith.divf %307, %308 : vector<16x1xf32>
    %310 = vector.broadcast %309 : vector<16x1xf32> to vector<16x32xf32>
    %311 = arith.subf %305, %310 : vector<16x32xf32>
    %312 = arith.mulf %311, %311 : vector<16x32xf32>
    %cst_101 = arith.constant dense<0.000000e+00> : vector<16xf32>
    %313 = vector.multi_reduction <add>, %312, %cst_101 [1] : vector<16x32xf32> to vector<16xf32>
    %314 = vector.shape_cast %313 : vector<16xf32> to vector<16x1xf32>
    %cst_102 = arith.constant 3.200000e+01 : f32
    %315 = vector.broadcast %cst_102 : f32 to vector<16x1xf32>
    %316 = arith.divf %314, %315 : vector<16x1xf32>
    %317 = vector.broadcast %309 : vector<16x1xf32> to vector<16x32xf32>
    %318 = arith.subf %305, %317 : vector<16x32xf32>
    %cst_103 = arith.constant 9.99999997E-7 : f32
    %319 = vector.broadcast %cst_103 : f32 to vector<16x1xf32>
    %320 = arith.addf %316, %319 : vector<16x1xf32>
    %321 = math.rsqrt %320 : vector<16x1xf32>
    %322 = vector.broadcast %321 : vector<16x1xf32> to vector<16x32xf32>
    %323 = arith.mulf %318, %322 : vector<16x32xf32>
    %324 = vector.broadcast %181 : vector<1x32xf32> to vector<16x32xf32>
    %325 = arith.mulf %323, %324 : vector<16x32xf32>
    %326 = vector.broadcast %182 : vector<1x32xf32> to vector<16x32xf32>
    %327 = arith.addf %325, %326 : vector<16x32xf32>
    %cst_104 = arith.constant dense<0.000000e+00> : vector<16x64xf32>
    %328 = tpu.matmul %327, %174, %cst_104 {dimension_numbers = #tpu.dot_dimension_numbers<[1], [0], [0], [1], [0, 0, 1, 1], [], []>} : vector<16x32xf32>, vector<32x64xf32>, vector<16x64xf32> -> vector<16x64xf32>
    %329 = vector.broadcast %185 : vector<1x64xf32> to vector<16x64xf32>
    %330 = arith.addf %328, %329 : vector<16x64xf32>
    %cst_105 = arith.constant 0.000000e+00 : f32
    %331 = vector.broadcast %cst_105 : f32 to vector<16x64xf32>
    %332 = arith.maximumf %330, %331 : vector<16x64xf32>
    %cst_106 = arith.constant dense<0.000000e+00> : vector<16x32xf32>
    %333 = tpu.matmul %332, %176, %cst_106 {dimension_numbers = #tpu.dot_dimension_numbers<[1], [0], [0], [1], [0, 0, 1, 1], [], []>} : vector<16x64xf32>, vector<64x32xf32>, vector<16x32xf32> -> vector<16x32xf32>
    %334 = vector.broadcast %186 : vector<1x32xf32> to vector<16x32xf32>
    %335 = arith.addf %333, %334 : vector<16x32xf32>
    %336 = arith.addf %305, %335 : vector<16x32xf32>
    %c0_107 = arith.constant 0 : index
    %c0_108 = arith.constant 0 : index
    %337 = vector.load %arg6[%c0_107, %c0_108] : memref<2x32xf32, #tpu.memory_space<vmem>>, vector<2x32xf32>
    %338 = vector.extract_strided_slice %337 {offsets = [0, 0], sizes = [1, 32], strides = [1, 1]} : vector<2x32xf32> to vector<1x32xf32>
    %339 = vector.extract_strided_slice %337 {offsets = [1, 0], sizes = [1, 32], strides = [1, 1]} : vector<2x32xf32> to vector<1x32xf32>
    %cst_109 = arith.constant dense<0.000000e+00> : vector<16xf32>
    %340 = vector.multi_reduction <add>, %336, %cst_109 [1] : vector<16x32xf32> to vector<16xf32>
    %341 = vector.shape_cast %340 : vector<16xf32> to vector<16x1xf32>
    %cst_110 = arith.constant 3.200000e+01 : f32
    %342 = vector.broadcast %cst_110 : f32 to vector<16x1xf32>
    %343 = arith.divf %341, %342 : vector<16x1xf32>
    %344 = vector.broadcast %343 : vector<16x1xf32> to vector<16x32xf32>
    %345 = arith.subf %336, %344 : vector<16x32xf32>
    %346 = arith.mulf %345, %345 : vector<16x32xf32>
    %cst_111 = arith.constant dense<0.000000e+00> : vector<16xf32>
    %347 = vector.multi_reduction <add>, %346, %cst_111 [1] : vector<16x32xf32> to vector<16xf32>
    %348 = vector.shape_cast %347 : vector<16xf32> to vector<16x1xf32>
    %cst_112 = arith.constant 3.200000e+01 : f32
    %349 = vector.broadcast %cst_112 : f32 to vector<16x1xf32>
    %350 = arith.divf %348, %349 : vector<16x1xf32>
    %351 = vector.broadcast %343 : vector<16x1xf32> to vector<16x32xf32>
    %352 = arith.subf %336, %351 : vector<16x32xf32>
    %cst_113 = arith.constant 9.99999997E-7 : f32
    %353 = vector.broadcast %cst_113 : f32 to vector<16x1xf32>
    %354 = arith.addf %350, %353 : vector<16x1xf32>
    %355 = math.rsqrt %354 : vector<16x1xf32>
    %356 = vector.broadcast %355 : vector<16x1xf32> to vector<16x32xf32>
    %357 = arith.mulf %352, %356 : vector<16x32xf32>
    %358 = vector.broadcast %338 : vector<1x32xf32> to vector<16x32xf32>
    %359 = arith.mulf %357, %358 : vector<16x32xf32>
    %360 = vector.broadcast %339 : vector<1x32xf32> to vector<16x32xf32>
    %361 = arith.addf %359, %360 : vector<16x32xf32>
    %c0_114 = arith.constant 0 : index
    %c0_115 = arith.constant 0 : index
    %362 = vector.load %arg7[%c0_114, %c0_115] : memref<16x32xf32, #tpu.memory_space<vmem>>, vector<16x32xf32>
    tpu.vector_store %arg7[%c0_114, %c0_115], %361 {strides = array<i32>} : memref<16x32xf32, #tpu.memory_space<vmem>>, vector<16x32xf32>,
    return
  }
}

</mosaic_0001>

<bundles_post_ra>
// kernel: transformer_encoder.1
= control target key start
LH: loop header
LB: loop body
LE: loop exit
PB: predicated region body
PF: predicated region fallthrough
CT: control target
= control target key end

     0   :  { %12 = vsyncpa [#allocation3], 0  ;;  %s2680_s0 = inlined_call_operand.hbm [shape: f32[16,32], index: 0, kind: input, shape index: {}]   ;;  %s2681_s1 = inlined_call_operand.vmem [shape: f32[2,32,96], index: 1, kind: input, shape index: {}]   ;;  %s2682_s2 = inlined_call_operand.vmem [shape: f32[2,32,32], index: 2, kind: input, shape index: {}]   ;;  %s2683_s3 = inlined_call_operand.vmem [shape: f32[2,32,64], index: 3, kind: input, shape index: {}]   ;;  %s2684_s4 = inlined_call_operand.vmem [shape: f32[2,64,32], index: 4, kind: input, shape index: {}]   ;;  %s2685_s5 = inlined_call_operand.hbm [shape: f32[2,8,96], index: 5, kind: input, shape index: {}]   ;;  %s2686_s6 = inlined_call_operand.vmem [shape: f32[2,32], index: 6, kind: input, shape index: {}]   ;;  %s2687_s7 = inlined_call_operand.hbm [shape: f32[16,32], index: 7, kind: output, shape index: {}]  }
   0x1   :  { %13 = vsyncpa [#allocation6], 0 }
   0x2   :  { %14 = vsyncpa [#allocation4], 0  ;;  %s19_s26 = sshll.u32 %s2680_s0, 4  ;;  %s2158_s27 = smov [#allocation2]   ;;  %s20_s26 = int_to_ptr.hbm [resolvable:$true] %s19_s26 }
   0x3   :  { %s21_s28 = sshll.u32 %s2158_s27, 4  ;;  %s40_s8 = sshll.u32 %s2685_s5, 4  ;;  %s22_s28 = int_to_ptr.vmem [resolvable:$true] %s21_s28  ;;  %s41_s8 = int_to_ptr.hbm [resolvable:$true] %s40_s8 }
   0x4   :  { %s2159_s9 = smov 128   ;;  %s2160_s10 = smov 8  }
   0x5   :  { %27 = dma.hbm_to_vmem [thread:$0]  %s20_s26, 256, %s22_s28, [#allocation3], %s2159_s9, %s2159_s9, %s2160_s10  }
   0x6   :  { %s2161_s11 = smov [#allocation5]  }
   0x7   :  { %s42_s12 = sshll.u32 %s2161_s11, 4  ;;  %s43_s12 = int_to_ptr.vmem [resolvable:$true] %s42_s12 }
   0x8   :  { %48 = dma.hbm_to_vmem [thread:$0]  %s41_s8, 256, %s43_s12, [#allocation6], %s2159_s9, %s2159_s9, %s2160_s10  }
   0x9   :  { %2152 = dma.done.wait [#allocation3], 256  }
   0xa   :  { %2153 = vsyncadd [#allocation3], 4294967040 }
   0xb   :  { %2154 = dma.done.wait [#allocation6], 256  }
   0xc   :  { %2155 = vsyncadd [#allocation6], 4294967040  ;;  %vm82_vm0 = vcmask 261120   ;;  %v2227_v0 = vld [vmem:[#allocation2] sm:$0xff]  ;;  %v2229_v1 = vld [vmem:[#allocation2 + $0x8] sm:$0xff]  ;;  %v2162_v4 = vmov 32.0  }
   0xd   :  { %v83_v2 = vsel %vm82_vm0, %v2227_v0, 0.0  ;;  %v86_v3 = vsel %vm82_vm0, %v2229_v1, 0.0  ;;  %1994 = vrcp.f32 %v2162_v4  ;;  %v64_v21 = vld [vmem:[%s2681_s1 + $0x18] sm:$0xff]  ;;  %v63_v22 = vld [vmem:[%s2681_s1 + $0x10] sm:$0xff]  ;;  %v62_v23 = vld [vmem:[%s2681_s1 + $0x8] sm:$0xff]  ;;  %s2163_s19 = smov 96  }
   0xe   :  { %84 = vadd.xlane.f32.xlu0 %v83_v2  ;;  %87 = vadd.xlane.f32.xlu1 %v86_v3  ;;  %v61_v24 = vld [vmem:[%s2681_s1] sm:$0xff]  ;;  %v2257_v40 = vld [vmem:[#allocation5] sm:$0xff]  ;;  %s2164_s20 = smov 88   ;;  %s2165_s21 = smov 120   ;;  %vm173_vm8 = vcmask 64512   ;;  %vm905_vm12 = vcmask 523264  }
   0xf   :  { %159 = vmatpush.msra.mxu0 %v64_v21  ;;  %v134_v44 = vperm.slane %v2257_v40, 0  ;;  %v137_v48 = vperm.slane %v2257_v40, 1  ;;  %v140_v54 = vperm.slane %v2257_v40, 4  ;;  %s2166_s22 = smov 64   ;;  %s2167_s23 = smov 112  }
  0x10   :  { %s2168_s24 = smov 56   ;;  %s2169_s27 = smov 104  }
  0x11   :  { %160 = vmatpush.msra.mxu0 %v63_v22  ;;  %s2170_s28 = smov 72   ;;  %s2171_s29 = smov 80  }
  0x12   :  { %s2172_s11 = smov 40   ;;  %s2173_s12 = smov 48  }
  0x13   :  { %v1995_v5 = vpop.eup %1994  ;;  %161 = vmatpush.msra.mxu0 %v62_v23 }
  0x14   :  { %v90_v6 = vmul.f32 32.0, %v1995_v5  ;;  %vm94_vm1 = vweird.f32 %v1995_v5 }
  0x15   :  { %162 = vmatpush.msra.mxu0 %v61_v24 }
  0x16   :  { %v91_v7 = vsub.f32 1.0, %v90_v6 }
  0x18   :  { %v92_v8 = vmul.f32 %v1995_v5, %v91_v7 }
  0x1a   :  { %v93_v9 = vadd.f32 %v1995_v5, %v92_v8 }
  0x1c   :  { %v2235_v10 = vsel %vm94_vm1, %v1995_v5, %v93_v9 }
  0x81   :  { %v85_v11 = vpop.xlane.xlu0 %84  ;;  %v88_v12 = vpop.xlane.xlu1 %87 }
  0x82   :  { %v96_v13 = vmul.f32 %v2235_v10, %v85_v11  ;;  %v97_v14 = vmul.f32 %v2235_v10, %v88_v12 }
  0x84   :  { %v98_v15 = vsub.f32 %v2227_v0, %v96_v13  ;;  %v99_v16 = vsub.f32 %v2229_v1, %v97_v14 }
  0x86   :  { %v100_v17 = vmul.f32 %v98_v15, %v98_v15  ;;  %v101_v18 = vmul.f32 %v99_v16, %v99_v16 }
  0x88   :  { %v102_v19 = vsel %vm82_vm0, %v100_v17, 0.0  ;;  %v105_v20 = vsel %vm82_vm0, %v101_v18, 0.0 }
  0x89   :  { %103 = vadd.xlane.f32.xlu0 %v102_v19  ;;  %106 = vadd.xlane.f32.xlu2 %v105_v20 }
  0xfc   :  { %v104_v25 = vpop.xlane.xlu0 %103  ;;  %v107_v26 = vpop.xlane.xlu2 %106 }
  0xfd   :  { %v108_v27 = vmul.f32 %v104_v25, %v2235_v10  ;;  %v109_v28 = vmul.f32 %v107_v26, %v2235_v10  ;;  %v65_v25 = vld [vmem:[%s2682_s2] sm:$0xff] }
  0xfe   :  { %483 = vmatpush.msrb.mxu0 %v65_v25 }
  0xff   :  { %v110_v29 = vadd.f32 1e-06, %v108_v27  ;;  %v111_v30 = vadd.f32 1e-06, %v109_v28 }
 0x101   :  { %1996 = vrsqrt.f32 %v110_v29  ;;  %vm128_vm2 = vweird.f32 %v111_v30  ;;  %vm118_vm5 = vweird.f32 %v110_v29 }
 0x102   :  { %1998 = vrsqrt.f32 %v111_v30 }
 0x107   :  { %v1997_v31 = vpop.eup %1996 }
 0x108   :  { %v1999_v32 = vpop.eup %1998  ;;  %v113_v33 = vmul.f32 %v1997_v31, %v110_v29  ;;  %vm119_vm4 = vweird.f32 %v1997_v31 }
 0x109   :  { %v123_v34 = vmul.f32 %v1999_v32, %v111_v30  ;;  %vm129_vm3 = vweird.f32 %v1999_v32  ;;  %vm120_vm7 = vmor %vm118_vm5, %vm119_vm4 }
 0x10a   :  { %v114_v35 = vmul.f32 %v1997_v31, %v113_v33  ;;  %vm130_vm6 = vmor %vm128_vm2, %vm129_vm3 }
 0x10b   :  { %v124_v36 = vmul.f32 %v1999_v32, %v123_v34 }
 0x10c   :  { %v115_v37 = vmul.f32 0.5, %v114_v35 }
 0x10d   :  { %v125_v38 = vmul.f32 0.5, %v124_v36 }
 0x10e   :  { %v116_v39 = vsub.f32 1.5, %v115_v37 }
 0x10f   :  { %v126_v41 = vsub.f32 1.5, %v125_v38 }
 0x110   :  { %v117_v42 = vmul.f32 %v1997_v31, %v116_v39 }
 0x111   :  { %v127_v43 = vmul.f32 %v1999_v32, %v126_v41 }
 0x112   :  { %v121_v45 = vsel %vm120_vm7, %v1997_v31, %v117_v42 }
 0x113   :  { %v131_v46 = vsel %vm130_vm6, %v1999_v32, %v127_v43  ;;  %v132_v47 = vmul.f32 %v121_v45, %v98_v15 }
 0x114   :  { %v133_v50 = vmul.f32 %v131_v46, %v99_v16 }
 0x115   :  { %v135_v49 = vmul.f32 %v134_v44, %v132_v47 }
 0x116   :  { %v136_v52 = vmul.f32 %v134_v44, %v133_v50 }
 0x117   :  { %v138_v51 = vadd.f32 %v137_v48, %v135_v49 }
 0x118   :  { %v139_v53 = vadd.f32 %v137_v48, %v136_v52 }
 0x119   :  { %1881 = vmatmul.msk.f32.vlgmr.msra.gmra.mxu0 %vm82_vm0, %v138_v51 }
 0x121   :  { %1882 = vmatmul.msk.f32.gmra.mxu0 %vm82_vm0, %v139_v53 }
 0x196   :  { %v164_v55 = vpop.f32.mrf.mxu0 }
 0x197   :  { %v2264_v56 = vadd.f32 %v164_v55, %v140_v54 }
 0x199   :  { %171 = vrot.lane.b32.xlu1 %v2264_v56, %s2163_s19 }
 0x19e   :  { %v167_v57 = vpop.f32.mrf.mxu0 }
 0x19f   :  { %v2268_v58 = vadd.f32 %v167_v57, %v140_v54 }
 0x1a1   :  { %199 = vrot.lane.b32.xlu0 %v2268_v58, %s2163_s19  ;;  %303 = vrot.lane.b32.xlu1 %v2264_v56, %s2164_s20 }
 0x1a9   :  { %301 = vrot.lane.b32.xlu0 %v2264_v56, %s2165_s21  ;;  %331 = vrot.lane.b32.xlu1 %v2268_v58, %s2164_s20 }
 0x1b1   :  { %329 = vrot.lane.b32.xlu0 %v2268_v58, %s2165_s21 }
 0x20b   :  { %v172_v59 = vpop.permute.xlu1 %171 }
 0x20c   :  { %1883 = vmatpush.xpose.msk.msra.mxu1 %vm173_vm8, %v172_v59 }
 0x20f   :  { %1884 = vmatmul.msk.f32.vlgmr.msra.gmra.mxu1 %vm173_vm8, %v2264_v56 }
 0x213   :  { %v200_v60 = vpop.permute.xlu0 %199  ;;  %v304_v61 = vpop.permute.xlu1 %303 }
 0x214   :  { %1885 = vmatpush.xpose.msk.msra.mxu2 %vm173_vm8, %v200_v60 }
 0x217   :  { %1886 = vmatmul.msk.f32.vlgmr.msra.gmra.mxu2 %vm173_vm8, %v2268_v58 }
 0x21b   :  { %v302_v62 = vpop.permute.xlu0 %301  ;;  %v332_v63 = vpop.permute.xlu1 %331 }
 0x21c   :  { %1891 = vmatpush.xpose.msk.msrb.mxu2 %vm173_vm8, %v332_v63 }
 0x223   :  { %v330_v2 = vpop.permute.xlu0 %329 }
 0x224   :  { %1892 = vmatmul.msk.f32.vlgmr.msrb.gmra.mxu2 %vm173_vm8, %v330_v2  ;;  %v66_v2 = vld [vmem:[%s2682_s2 + $0x8] sm:$0xff] }
 0x225   :  { %454 = vmatpush.msra.mxu2 %v66_v2 }
 0x28c   :  { %v195_v3 = vpop.f32.mrf.mxu1 }
 0x28d   :  { %v225_v4 = vmul.f32 0.17677669, %v195_v3 }
 0x28f   :  { %v227_v5 = vsel %vm173_vm8, %v225_v4, -inf }
 0x290   :  { %228 = vmax.xlane.f32.xlu2 %v227_v5 }
 0x29a   :  { %v222_v12 = vpop.f32.mrf.mxu2 }
 0x29b   :  { %v226_v13 = vmul.f32 0.17677669, %v222_v12 }
 0x29d   :  { %v230_v14 = vsel %vm173_vm8, %v226_v13, -inf }
 0x2a7   :  { %v354_v26 = vpop.f32.mrf.mxu2 }
 0x2a8   :  { %v358_v27 = vmul.f32 0.17677669, %v354_v26 }
 0x2aa   :  { %v362_v29 = vsel %vm173_vm8, %v358_v27, -inf }
 0x303   :  { %v229_v6 = vpop.xlane.xlu2 %228 }
 0x304   :  { %v233_v7 = vsub.f32 %v225_v4, %v229_v6 }
 0x306   :  { %v235_v8 = vmul.f32 1.442695, %v233_v7 }
 0x308   :  { %2000 = vpow2.f32 %v235_v8 }
 0x30e   :  { %v2001_v9 = vpop.eup %2000 }
 0x30f   :  { %v239_v11 = vsel %vm173_vm8, %v2001_v9, 0.0 }
 0x310   :  { %240 = vadd.xlane.f32.xlu2 %v239_v11 }
 0x328   :  { %249 = vrot.lane.b32.xlu2 %v2264_v56, %s2166_s22 }
 0x351   :  { %231 = vmax.xlane.f32.xlu2 %v230_v14 }
 0x369   :  { %275 = vrot.lane.b32.xlu2 %v2268_v58, %s2166_s22 }
 0x371   :  { %491 = vrot.lane.b32.xlu2 %v2264_v56, %s2167_s23 }
 0x383   :  { %v241_v15 = vpop.xlane.xlu2 %240 }
 0x384   :  { %2002 = vrcp.f32 %v241_v15 }
 0x38a   :  { %v2003_v16 = vpop.eup %2002 }
 0x38b   :  { %v250_v17 = vpop.permute.xlu2 %249  ;;  %v247_v18 = vmul.f32 %v2003_v16, %v2001_v9 }
 0x38c   :  { %270 = vmatpush.msrb.mxu1 %v250_v17 }
 0x38d   :  { %1887 = vmatmul.msk.f32.vlgmr.msrb.gmra.mxu1 %vm173_vm8, %v247_v18 }
 0x38e   :  { %1889 = vmatpush.xpose.msk.msra.mxu1 %vm173_vm8, %v304_v61 }
 0x395   :  { %1890 = vmatmul.msk.f32.vlgmr.msra.gmra.mxu1 %vm173_vm8, %v302_v62 }
 0x3c4   :  { %v232_v19 = vpop.xlane.xlu2 %231 }
 0x3c5   :  { %v234_v20 = vsub.f32 %v226_v13, %v232_v19 }
 0x3c7   :  { %v237_v21 = vmul.f32 1.442695, %v234_v20 }
 0x3c9   :  { %2004 = vpow2.f32 %v237_v21 }
 0x3cc   :  { %v276_v22 = vpop.permute.xlu2 %275 }
 0x3cd   :  { %296 = vmatpush.msra.mxu3 %v276_v22 }
 0x3cf   :  { %v2005_v23 = vpop.eup %2004 }
 0x3d0   :  { %v242_v24 = vsel %vm173_vm8, %v2005_v23, 0.0 }
 0x3d1   :  { %243 = vadd.xlane.f32.xlu0 %v242_v24 }
 0x3d4   :  { %v492_v52 = vpop.permute.xlu2 %491 }
 0x3e5   :  { %381 = vrot.lane.b32.xlu0 %v2264_v56, %s2168_s24 }
 0x40a   :  { %v272_v28 = vpop.f32.mrf.mxu1 }
 0x40b   :  { %1897 = vmatmul.msk.f32.vlgmr.msrb.gmra.mxu0 %vm173_vm8, %v272_v28 }
 0x40f   :  { %363 = vmax.xlane.f32.xlu0 %v362_v29 }
 0x412   :  { %v326_v30 = vpop.f32.mrf.mxu1 }
 0x413   :  { %v357_v31 = vmul.f32 0.17677669, %v326_v30 }
 0x415   :  { %v359_v32 = vsel %vm173_vm8, %v357_v31, -inf }
 0x416   :  { %360 = vmax.xlane.f32.xlu1 %v359_v32 }
 0x423   :  { %654 = vrot.lane.b32.xlu0 %v2264_v56, %s2169_s27 }
 0x42b   :  { %684 = vrot.lane.b32.xlu0 %v2268_v58, %s2170_s28 }
 0x433   :  { %682 = vrot.lane.b32.xlu0 %v2268_v58, %s2169_s27 }
 0x444   :  { %v244_v33 = vpop.xlane.xlu0 %243 }
 0x445   :  { %2006 = vrcp.f32 %v244_v33 }
 0x44b   :  { %v2007_v34 = vpop.eup %2006 }
 0x44c   :  { %v248_v35 = vmul.f32 %v2007_v34, %v2005_v23 }
 0x44e   :  { %1888 = vmatmul.msk.f32.vlgmr.msra.gmra.mxu3 %vm173_vm8, %v248_v35 }
 0x457   :  { %v382_v36 = vpop.permute.xlu0 %381 }
 0x458   :  { %402 = vmatpush.msrb.mxu3 %v382_v36 }
 0x482   :  { %v364_v37 = vpop.xlane.xlu0 %363 }
 0x483   :  { %v366_v38 = vsub.f32 %v358_v27, %v364_v37  ;;  %v67_v37 = vld [vmem:[%s2682_s2 + $0x10] sm:$0xff] }
 0x484   :  { %644 = vmatpush.msrb.mxu2 %v67_v37 }
 0x485   :  { %v369_v39 = vmul.f32 1.442695, %v366_v38 }
 0x487   :  { %2008 = vpow2.f32 %v369_v39 }
 0x488   :  { %v2350_v24 = vpop.f32.mrf.mxu0 }
 0x489   :  { %v361_v41 = vpop.xlane.xlu1 %360 }
 0x48a   :  { %v365_v42 = vsub.f32 %v357_v31, %v361_v41 }
 0x48c   :  { %v367_v43 = vmul.f32 1.442695, %v365_v42 }
 0x48d   :  { %v2009_v44 = vpop.eup %2008 }
 0x48e   :  { %2010 = vpow2.f32 %v367_v43  ;;  %v374_v45 = vsel %vm173_vm8, %v2009_v44, 0.0 }
 0x48f   :  { %375 = vadd.xlane.f32.xlu2 %v374_v45 }
 0x494   :  { %v2011_v46 = vpop.eup %2010 }
 0x495   :  { %v371_v47 = vsel %vm173_vm8, %v2011_v46, 0.0  ;;  %v655_v63 = vpop.permute.xlu0 %654 }
 0x496   :  { %372 = vadd.xlane.f32.xlu1 %v371_v47 }
 0x49d   :  { %v685_v12 = vpop.permute.xlu0 %684 }
 0x4a5   :  { %v683_v16 = vpop.permute.xlu0 %682 }
 0x4af   :  { %493 = vrot.lane.b32.xlu1 %v2264_v56, %s2171_s29 }
 0x4b7   :  { %407 = vrot.lane.b32.xlu1 %v2268_v58, %s2168_s24 }
 0x4bf   :  { %521 = vrot.lane.b32.xlu1 %v2268_v58, %s2171_s29 }
 0x4c7   :  { %519 = vrot.lane.b32.xlu1 %v2268_v58, %s2167_s23 }
 0x4cf   :  { %656 = vrot.lane.b32.xlu1 %v2264_v56, %s2170_s28 }
 0x4d1   :  { %v298_v48 = vpop.f32.mrf.mxu3 }
 0x4d2   :  { %1898 = vmatmul.msk.f32.gmra.mxu0 %vm173_vm8, %v298_v48 }
 0x502   :  { %v376_v53 = vpop.xlane.xlu2 %375 }
 0x509   :  { %v373_v49 = vpop.xlane.xlu1 %372 }
 0x50a   :  { %2012 = vrcp.f32 %v373_v49 }
 0x50b   :  { %2014 = vrcp.f32 %v376_v53 }
 0x510   :  { %v2013_v50 = vpop.eup %2012 }
 0x511   :  { %v379_v51 = vmul.f32 %v2013_v50, %v2011_v46  ;;  %v2015_v55 = vpop.eup %2014 }
 0x512   :  { %v380_v57 = vmul.f32 %v2015_v55, %v2009_v44 }
 0x513   :  { %1893 = vmatmul.msk.f32.vlgmr.msrb.gmra.mxu3 %vm173_vm8, %v379_v51 }
 0x521   :  { %v494_v54 = vpop.permute.xlu1 %493 }
 0x522   :  { %1899 = vmatpush.xpose.msk.msra.mxu3 %vm173_vm8, %v494_v54 }
 0x525   :  { %1900 = vmatmul.msk.f32.vlgmr.msra.gmra.mxu3 %vm173_vm8, %v492_v52 }
 0x529   :  { %v408_v59 = vpop.permute.xlu1 %407 }
 0x52a   :  { %428 = vmatpush.msrb.mxu1 %v408_v59 }
 0x52b   :  { %1894 = vmatmul.msk.f32.vlgmr.msrb.gmra.mxu1 %vm173_vm8, %v380_v57  ;;  %v68_v57 = vld [vmem:[%s2682_s2 + $0x18] sm:$0xff] }
 0x531   :  { %v522_v60 = vpop.permute.xlu1 %521 }
 0x532   :  { %1901 = vmatpush.xpose.msk.msra.mxu1 %vm173_vm8, %v522_v60 }
 0x539   :  { %v520_v61 = vpop.permute.xlu1 %519 }
 0x53a   :  { %1902 = vmatmul.msk.f32.vlgmr.msra.gmra.mxu1 %vm173_vm8, %v520_v61 }
 0x541   :  { %v657_v62 = vpop.permute.xlu1 %656 }
 0x542   :  { %1907 = vmatpush.xpose.msk.msra.mxu0 %vm173_vm8, %v657_v62 }
 0x545   :  { %1908 = vmatmul.msk.f32.vlgmr.msra.gmra.mxu0 %vm173_vm8, %v655_v63 }
 0x54f   :  { %v2352_v25 = vpop.f32.mrf.mxu0 }
 0x596   :  { %v404_v3 = vpop.f32.mrf.mxu3 }
 0x597   :  { %1895 = vmatmul.msk.f32.vlgmr.msra.gmra.mxu2 %vm173_vm8, %v404_v3 }
 0x5a8   :  { %v430_v4 = vpop.f32.mrf.mxu1  ;;  %v516_v5 = vpop.f32.mrf.mxu3 }
 0x5a9   :  { %v547_v6 = vmul.f32 0.17677669, %v516_v5  ;;  %1896 = vmatmul.msk.f32.gmra.mxu2 %vm173_vm8, %v430_v4 }
 0x5ab   :  { %v549_v7 = vsel %vm173_vm8, %v547_v6, -inf }
 0x5ac   :  { %550 = vmax.xlane.f32.xlu1 %v549_v7  ;;  %v817_v7 = vperm.slane %v2257_v40, 5 }
 0x5b7   :  { %v544_v8 = vpop.f32.mrf.mxu1 }
 0x5b8   :  { %v548_v9 = vmul.f32 0.17677669, %v544_v8 }
 0x5ba   :  { %v552_v11 = vsel %vm173_vm8, %v548_v9, -inf }
 0x5bb   :  { %553 = vmax.xlane.f32.xlu0 %v552_v11 }
 0x5c2   :  { %v679_v26 = vpop.f32.mrf.mxu0 }
 0x5c3   :  { %v710_v27 = vmul.f32 0.17677669, %v679_v26 }
 0x5c5   :  { %v712_v28 = vsel %vm173_vm8, %v710_v27, -inf }
 0x5cf   :  { %734 = vrot.lane.b32.xlu0 %v2264_v56, %s2172_s11 }
 0x61a   :  { %v456_v2 = vpop.f32.mrf.mxu2 }
 0x61b   :  { %v486_v5 = vadd.f32 %v2350_v24, %v456_v2 }
 0x61f   :  { %v551_v13 = vpop.xlane.xlu1 %550 }
 0x620   :  { %v555_v14 = vsub.f32 %v547_v6, %v551_v13 }
 0x622   :  { %v557_v15 = vmul.f32 1.442695, %v555_v14 }
 0x624   :  { %2016 = vpow2.f32 %v557_v15 }
 0x62a   :  { %v2017_v17 = vpop.eup %2016 }
 0x62b   :  { %v561_v18 = vsel %vm173_vm8, %v2017_v17, 0.0 }
 0x62c   :  { %562 = vadd.xlane.f32.xlu2 %v561_v18  ;;  %v459_v3 = vpop.f32.mrf.mxu2 }
 0x62e   :  { %v554_v19 = vpop.xlane.xlu0 %553 }
 0x62f   :  { %v556_v20 = vsub.f32 %v548_v9, %v554_v19 }
 0x631   :  { %v559_v21 = vmul.f32 1.442695, %v556_v20 }
 0x633   :  { %2018 = vpow2.f32 %v559_v21 }
 0x639   :  { %v2019_v22 = vpop.eup %2018 }
 0x63a   :  { %v564_v23 = vsel %vm173_vm8, %v2019_v22, 0.0 }
 0x63b   :  { %565 = vadd.xlane.f32.xlu1 %v564_v23 }
 0x641   :  { %v735_v48 = vpop.permute.xlu0 %734 }
 0x644   :  { %571 = vrot.lane.b32.xlu2 %v2264_v56, %s2173_s12 }
 0x66d   :  { %713 = vmax.xlane.f32.xlu2 %v712_v28  ;;  %v72_v28 = vld [vmem:[%s2683_s3 + $0x18] sm:$0xff] }
 0x69f   :  { %v563_v29 = vpop.xlane.xlu2 %562 }
 0x6a0   :  { %2020 = vrcp.f32 %v563_v29  ;;  %v70_v29 = vld [vmem:[%s2683_s3 + $0x8] sm:$0xff] }
 0x6a6   :  { %v2021_v30 = vpop.eup %2020 }
 0x6a7   :  { %v569_v31 = vmul.f32 %v2021_v30, %v2017_v17  ;;  %v572_v32 = vpop.permute.xlu2 %571 }
 0x6a8   :  { %592 = vmatpush.msrb.mxu3 %v572_v32 }
 0x6a9   :  { %1903 = vmatmul.msk.f32.vlgmr.msrb.gmra.mxu3 %vm173_vm8, %v569_v31 }
 0x6aa   :  { %1909 = vmatpush.xpose.msk.msra.mxu3 %vm173_vm8, %v685_v12 }
 0x6ae   :  { %v566_v43 = vpop.xlane.xlu1 %565  ;;  %807 = vmatpush.msrb.mxu3 %v68_v57  ;;  %v73_v57 = vld [vmem:[%s2684_s4] sm:$0xff] }
 0x6b1   :  { %1910 = vmatmul.msk.f32.vlgmr.msra.gmra.mxu3 %vm173_vm8, %v683_v16 }
 0x6e0   :  { %v714_v56 = vpop.xlane.xlu2 %713 }
 0x6e1   :  { %v718_v33 = vsub.f32 %v710_v27, %v714_v56 }
 0x6e3   :  { %v720_v34 = vmul.f32 1.442695, %v718_v33 }
 0x6e5   :  { %2022 = vpow2.f32 %v720_v34 }
 0x6e6   :  { %2024 = vrcp.f32 %v566_v43 }
 0x6eb   :  { %v2023_v35 = vpop.eup %2022 }
 0x6ec   :  { %v724_v36 = vsel %vm173_vm8, %v2023_v35, 0.0  ;;  %v2025_v45 = vpop.eup %2024 }
 0x6ed   :  { %725 = vadd.xlane.f32.xlu1 %v724_v36  ;;  %v570_v46 = vmul.f32 %v2025_v45, %v2019_v22  ;;  %v80_v45 = vld [vmem:[%s2684_s4 + $0x38] sm:$0xff] }
 0x6ee   :  { %920 = vmatpush.msra.mxu2 %v80_v45 }
 0x706   :  { %597 = vrot.lane.b32.xlu1 %v2268_v58, %s2173_s12 }
 0x72c   :  { %v594_v38 = vpop.f32.mrf.mxu3 }
 0x72d   :  { %1905 = vmatmul.msk.f32.vlgmr.msrb.gmra.mxu2 %vm173_vm8, %v594_v38  ;;  %v866_v38 = vperm.slane %v2257_v40, 2 }
 0x734   :  { %v707_v39 = vpop.f32.mrf.mxu3 }
 0x735   :  { %v711_v41 = vmul.f32 0.17677669, %v707_v39 }
 0x737   :  { %v715_v42 = vsel %vm173_vm8, %v711_v41, -inf }
 0x738   :  { %716 = vmax.xlane.f32.xlu2 %v715_v42  ;;  %v869_v42 = vperm.slane %v2257_v40, 3 }
 0x750   :  { %760 = vrot.lane.b32.xlu2 %v2268_v58, %s2172_s11 }
 0x760   :  { %v726_v44 = vpop.xlane.xlu1 %725 }
 0x761   :  { %2026 = vrcp.f32 %v726_v44 }
 0x767   :  { %v2027_v49 = vpop.eup %2026 }
 0x768   :  { %v732_v50 = vmul.f32 %v2027_v49, %v2023_v35  ;;  %v76_v49 = vld [vmem:[%s2684_s4 + $0x18] sm:$0xff] }
 0x778   :  { %v598_v47 = vpop.permute.xlu1 %597 }
 0x779   :  { %618 = vmatpush.msrb.mxu1 %v598_v47  ;;  %v78_v47 = vld [vmem:[%s2684_s4 + $0x28] sm:$0xff] }
 0x77a   :  { %1904 = vmatmul.msk.f32.vlgmr.msrb.gmra.mxu1 %vm173_vm8, %v570_v46  ;;  %v79_v46 = vld [vmem:[%s2684_s4 + $0x30] sm:$0xff] }
 0x77b   :  { %755 = vmatpush.msra.mxu1 %v735_v48  ;;  %921 = vmatpush.msra.mxu2 %v79_v46  ;;  %v77_v48 = vld [vmem:[%s2684_s4 + $0x20] sm:$0xff] }
 0x77d   :  { %891 = vmatpush.msrb.mxu1 %v72_v28  ;;  %922 = vmatpush.msra.mxu2 %v78_v47 }
 0x77f   :  { %923 = vmatpush.msra.mxu2 %v77_v48 }
 0x781   :  { %924 = vmatpush.msra.mxu2 %v76_v49 }
 0x782   :  { %1911 = vmatmul.msk.f32.vlgmr.msra.gmra.mxu1 %vm173_vm8, %v732_v50 }
 0x7ab   :  { %v717_v51 = vpop.xlane.xlu2 %716 }
 0x7ac   :  { %v719_v52 = vsub.f32 %v711_v41, %v717_v51 }
 0x7ae   :  { %v722_v53 = vmul.f32 1.442695, %v719_v52 }
 0x7b0   :  { %2028 = vpow2.f32 %v722_v53  ;;  %v646_v4 = vpop.f32.mrf.mxu2 }
 0x7b1   :  { %v652_v6 = vadd.f32 %v646_v4, %v486_v5 }
 0x7b3   :  { %v761_v58 = vpop.permute.xlu2 %760 }
 0x7b4   :  { %781 = vmatpush.msrb.mxu0 %v761_v58 }
 0x7b6   :  { %v2029_v54 = vpop.eup %2028 }
 0x7b7   :  { %v727_v55 = vsel %vm173_vm8, %v2029_v54, 0.0 }
 0x7b8   :  { %728 = vadd.xlane.f32.xlu1 %v727_v55  ;;  %v74_v55 = vld [vmem:[%s2684_s4 + $0x8] sm:$0xff] }
 0x7f7   :  { %v620_v59 = vpop.f32.mrf.mxu1 }
 0x7f8   :  { %1906 = vmatmul.msk.f32.gmra.mxu2 %vm173_vm8, %v620_v59  ;;  %v872_v59 = vperm.slane %v2257_v40, 6 }
 0x7ff   :  { %v757_v60 = vpop.f32.mrf.mxu1 }
 0x800   :  { %1913 = vmatmul.msk.f32.vlgmr.msrb.gmra.mxu3 %vm173_vm8, %v757_v60 }
 0x82b   :  { %v729_v61 = vpop.xlane.xlu1 %728 }
 0x82c   :  { %2030 = vrcp.f32 %v729_v61 }
 0x832   :  { %v2031_v62 = vpop.eup %2030 }
 0x833   :  { %v733_v63 = vmul.f32 %v2031_v62, %v2029_v54  ;;  %v75_v54 = vld [vmem:[%s2684_s4 + $0x10] sm:$0xff] }
 0x834   :  { %925 = vmatpush.msra.mxu2 %v75_v54 }
 0x835   :  { %1912 = vmatmul.msk.f32.vlgmr.msrb.gmra.mxu0 %vm173_vm8, %v733_v63 }
 0x836   :  { %926 = vmatpush.msra.mxu2 %v74_v55 }
 0x838   :  { %927 = vmatpush.msra.mxu2 %v73_v57 }
 0x87b   :  { %v649_v20 = vpop.f32.mrf.mxu2 }
 0x883   :  { %v809_v8 = vpop.f32.mrf.mxu3 }
 0x884   :  { %v815_v9 = vadd.f32 %v809_v8, %v652_v6 }
 0x886   :  { %v818_v11 = vadd.f32 %v817_v7, %v815_v9 }
 0x888   :  { %v2380_v12 = vadd.f32 %v818_v11, %v2227_v0  ;;  %v489_v0 = vadd.f32 %v2352_v25, %v459_v3  ;;  %v71_v25 = vld [vmem:[%s2683_s3 + $0x10] sm:$0xff] }
 0x889   :  { %892 = vmatpush.msrb.mxu1 %v71_v25 }
 0x88a   :  { %v822_v13 = vsel %vm82_vm0, %v2380_v12, 0.0  ;;  %v653_v21 = vadd.f32 %v649_v20, %v489_v0 }
 0x88b   :  { %823 = vadd.xlane.f32.xlu0 %v822_v13  ;;  %893 = vmatpush.msrb.mxu1 %v70_v29 }
 0x8b2   :  { %v783_v14 = vpop.f32.mrf.mxu0 }
 0x8b3   :  { %1914 = vmatmul.msk.f32.gmra.mxu3 %vm173_vm8, %v783_v14 }
 0x8fe   :  { %v824_v15 = vpop.xlane.xlu0 %823 }
 0x8ff   :  { %v828_v16 = vmul.f32 %v824_v15, %v2235_v10 }
 0x901   :  { %v830_v17 = vsub.f32 %v2380_v12, %v828_v16  ;;  %v904_v16 = vperm.slane %v2257_v40, 7 }
 0x903   :  { %v832_v18 = vmul.f32 %v830_v17, %v830_v17 }
 0x905   :  { %v834_v19 = vsel %vm82_vm0, %v832_v18, 0.0 }
 0x906   :  { %835 = vadd.xlane.f32.xlu2 %v834_v19 }
 0x936   :  { %v812_v22 = vpop.f32.mrf.mxu3 }
 0x937   :  { %v816_v23 = vadd.f32 %v812_v22, %v653_v21 }
 0x939   :  { %v819_v24 = vadd.f32 %v817_v7, %v816_v23 }
 0x93b   :  { %v2390_v26 = vadd.f32 %v819_v24, %v2229_v1  ;;  %v69_v1 = vld [vmem:[%s2683_s3] sm:$0xff] }
 0x93c   :  { %894 = vmatpush.msrb.mxu1 %v69_v1 }
 0x93d   :  { %v825_v27 = vsel %vm82_vm0, %v2390_v26, 0.0 }
 0x93e   :  { %826 = vadd.xlane.f32.xlu1 %v825_v27 }
 0x979   :  { %v836_v30 = vpop.xlane.xlu2 %835 }
 0x97a   :  { %v840_v31 = vmul.f32 %v836_v30, %v2235_v10  ;;  %v1922_v30 = vld [vmem:[%s2681_s1 + $0x38] sm:$0xff] }
 0x97b   :  { %1032 = vmatpush.msra.mxu0 %v1922_v30 }
 0x97c   :  { %v842_v32 = vadd.f32 1e-06, %v840_v31  ;;  %v1921_v31 = vld [vmem:[%s2681_s1 + $0x30] sm:$0xff] }
 0x97d   :  { %1033 = vmatpush.msra.mxu0 %v1921_v31 }
 0x97e   :  { %2032 = vrsqrt.f32 %v842_v32  ;;  %vm850_vm10 = vweird.f32 %v842_v32 }
 0x984   :  { %v2033_v56 = vpop.eup %2032 }
 0x985   :  { %v845_v33 = vmul.f32 %v2033_v56, %v842_v32  ;;  %vm851_vm9 = vweird.f32 %v2033_v56  ;;  %v1920_v32 = vld [vmem:[%s2681_s1 + $0x28] sm:$0xff] }
 0x986   :  { %vm852_vm11 = vmor %vm850_vm10, %vm851_vm9  ;;  %1034 = vmatpush.msra.mxu0 %v1920_v32 }
 0x987   :  { %v846_v34 = vmul.f32 %v2033_v56, %v845_v33 }
 0x989   :  { %v847_v35 = vmul.f32 0.5, %v846_v34 }
 0x98b   :  { %v848_v36 = vsub.f32 1.5, %v847_v35 }
 0x98d   :  { %v849_v37 = vmul.f32 %v2033_v56, %v848_v36 }
 0x98f   :  { %v853_v39 = vsel %vm852_vm11, %v2033_v56, %v849_v37 }
 0x990   :  { %v864_v41 = vmul.f32 %v853_v39, %v830_v17  ;;  %v2469_v39 = vld [vmem:[#allocation5 + $0x8] sm:$0xff] }
 0x991   :  { %v1010_v46 = vperm.slane %v2469_v39, 1 }
 0x992   :  { %v867_v43 = vmul.f32 %v866_v38, %v864_v41 }
 0x994   :  { %v870_v44 = vadd.f32 %v869_v42, %v867_v43  ;;  %v1007_v43 = vperm.slane %v2469_v39, 0 }
 0x996   :  { %1915 = vmatmul.msk.f32.vlgmr.msrb.gmra.mxu1 %vm82_vm0, %v870_v44 }
 0x9b1   :  { %v827_v50 = vpop.xlane.xlu1 %826 }
 0x9b2   :  { %v829_v51 = vmul.f32 %v827_v50, %v2235_v10 }
 0x9b4   :  { %v831_v52 = vsub.f32 %v2390_v26, %v829_v51 }
 0x9b6   :  { %v833_v53 = vmul.f32 %v831_v52, %v831_v52 }
 0x9b8   :  { %v837_v58 = vsel %vm82_vm0, %v833_v53, 0.0 }
 0x9b9   :  { %838 = vadd.xlane.f32.xlu1 %v837_v58  ;;  %v1013_v58 = vperm.slane %v2469_v39, 4 }
 0xa13   :  { %v896_v60 = vpop.f32.mrf.mxu1 }
 0xa14   :  { %v897_v61 = vadd.f32 %v896_v60, %v872_v59 }
 0xa16   :  { %v902_v62 = vmax.f32 %v897_v61, 0.0 }
 0xa18   :  { %1917 = vmatmul.msk.f32.vlgmr.msra.gmra.mxu2 %vm905_vm12, %v902_v62 }
 0xa2c   :  { %v839_v63 = vpop.xlane.xlu1 %838 }
 0xa2d   :  { %v841_v2 = vmul.f32 %v839_v63, %v2235_v10 }
 0xa2f   :  { %v843_v3 = vadd.f32 1e-06, %v841_v2 }
 0xa31   :  { %2034 = vrsqrt.f32 %v843_v3  ;;  %vm860_vm14 = vweird.f32 %v843_v3 }
 0xa37   :  { %v2035_v4 = vpop.eup %2034 }
 0xa38   :  { %v855_v5 = vmul.f32 %v2035_v4, %v843_v3  ;;  %vm861_vm13 = vweird.f32 %v2035_v4 }
 0xa39   :  { %vm862_vm15 = vmor %vm860_vm14, %vm861_vm13 }
 0xa3a   :  { %v856_v6 = vmul.f32 %v2035_v4, %v855_v5 }
 0xa3c   :  { %v857_v7 = vmul.f32 0.5, %v856_v6 }
 0xa3e   :  { %v858_v8 = vsub.f32 1.5, %v857_v7 }
 0xa40   :  { %v859_v9 = vmul.f32 %v2035_v4, %v858_v8 }
 0xa42   :  { %v863_v11 = vsel %vm862_vm15, %v2035_v4, %v859_v9 }
 0xa43   :  { %v865_v13 = vmul.f32 %v863_v11, %v831_v52 }
 0xa45   :  { %v868_v14 = vmul.f32 %v866_v38, %v865_v13 }
 0xa47   :  { %v871_v15 = vadd.f32 %v869_v42, %v868_v14 }
 0xa49   :  { %1916 = vmatmul.msk.f32.gmra.mxu1 %vm82_vm0, %v871_v15 }
 0xa9b   :  { %v929_v17 = vpop.f32.mrf.mxu2 }
 0xa9c   :  { %v930_v18 = vadd.f32 %v929_v17, %v904_v16 }
 0xa9e   :  { %v2443_v19 = vadd.f32 %v930_v18, %v2380_v12 }
 0xaa0   :  { %v963_v20 = vsel %vm82_vm0, %v2443_v19, 0.0 }
 0xaa1   :  { %964 = vadd.xlane.f32.xlu0 %v963_v20 }
 0xac6   :  { %v899_v0 = vpop.f32.mrf.mxu1 }
 0xac7   :  { %v900_v21 = vadd.f32 %v899_v0, %v872_v59 }
 0xac9   :  { %v903_v22 = vmax.f32 %v900_v21, 0.0 }
 0xacb   :  { %1918 = vmatmul.msk.f32.gmra.mxu2 %vm905_vm12, %v903_v22 }
 0xb14   :  { %v965_v23 = vpop.xlane.xlu0 %964 }
 0xb15   :  { %v969_v24 = vmul.f32 %v965_v23, %v2235_v10 }
 0xb17   :  { %v971_v27 = vsub.f32 %v2443_v19, %v969_v24 }
 0xb19   :  { %v973_v40 = vmul.f32 %v971_v27, %v971_v27 }
 0xb1b   :  { %v975_v28 = vsel %vm82_vm0, %v973_v40, 0.0 }
 0xb1c   :  { %976 = vadd.xlane.f32.xlu1 %v975_v28 }
 0xb4e   :  { %v932_v12 = vpop.f32.mrf.mxu2 }
 0xb4f   :  { %v933_v25 = vadd.f32 %v932_v12, %v904_v16 }
 0xb51   :  { %v2452_v29 = vadd.f32 %v933_v25, %v2390_v26  ;;  %v1919_v26 = vld [vmem:[%s2681_s1 + $0x20] sm:$0xff] }
 0xb52   :  { %1035 = vmatpush.msra.mxu0 %v1919_v26 }
 0xb53   :  { %v966_v1 = vsel %vm82_vm0, %v2452_v29, 0.0 }
 0xb54   :  { %967 = vadd.xlane.f32.xlu0 %v966_v1 }
 0xb8f   :  { %v977_v56 = vpop.xlane.xlu1 %976 }
 0xb90   :  { %v981_v33 = vmul.f32 %v977_v56, %v2235_v10 }
 0xb92   :  { %v983_v34 = vadd.f32 1e-06, %v981_v33 }
 0xb94   :  { %2036 = vrsqrt.f32 %v983_v34  ;;  %vm991_vm2 = vweird.f32 %v983_v34 }
 0xb9a   :  { %v2037_v35 = vpop.eup %2036 }
 0xb9b   :  { %v986_v36 = vmul.f32 %v2037_v35, %v983_v34  ;;  %vm992_vm1 = vweird.f32 %v2037_v35 }
 0xb9c   :  { %vm993_vm3 = vmor %vm991_vm2, %vm992_vm1 }
 0xb9d   :  { %v987_v37 = vmul.f32 %v2037_v35, %v986_v36 }
 0xb9f   :  { %v988_v38 = vmul.f32 0.5, %v987_v37 }
 0xba1   :  { %v989_v41 = vsub.f32 1.5, %v988_v38 }
 0xba3   :  { %v990_v42 = vmul.f32 %v2037_v35, %v989_v41 }
 0xba5   :  { %v994_v44 = vsel %vm993_vm3, %v2037_v35, %v990_v42 }
 0xba6   :  { %v1005_v45 = vmul.f32 %v994_v44, %v971_v27 }
 0xba8   :  { %v1008_v47 = vmul.f32 %v1007_v43, %v1005_v45 }
 0xbaa   :  { %v1011_v48 = vadd.f32 %v1010_v46, %v1008_v47 }
 0xbac   :  { %1939 = vmatmul.msk.f32.vlgmr.msra.gmra.mxu0 %vm82_vm0, %v1011_v48 }
 0xbc7   :  { %v968_v49 = vpop.xlane.xlu0 %967 }
 0xbc8   :  { %v970_v50 = vmul.f32 %v968_v49, %v2235_v10 }
 0xbca   :  { %v972_v51 = vsub.f32 %v2452_v29, %v970_v50 }
 0xbcc   :  { %v974_v52 = vmul.f32 %v972_v51, %v972_v51 }
 0xbce   :  { %v978_v53 = vsel %vm82_vm0, %v974_v52, 0.0 }
 0xbcf   :  { %979 = vadd.xlane.f32.xlu1 %v978_v53  ;;  %v1923_v53 = vld [vmem:[%s2682_s2 + $0x20] sm:$0xff] }
 0xc29   :  { %v1037_v54 = vpop.f32.mrf.mxu0 }
 0xc2a   :  { %v2478_v55 = vadd.f32 %v1037_v54, %v1013_v58 }
 0xc2c   :  { %1173 = vrot.lane.b32.xlu1 %v2478_v55, %s2165_s21  ;;  %1175 = vrot.lane.b32.xlu0 %v2478_v55, %s2164_s20 }
 0xc2d   :  { %1044 = vrot.lane.b32.xlu2 %v2478_v55, %s2163_s19 }
 0xc42   :  { %v980_v57 = vpop.xlane.xlu1 %979 }
 0xc43   :  { %v982_v59 = vmul.f32 %v980_v57, %v2235_v10 }
 0xc45   :  { %v984_v60 = vadd.f32 1e-06, %v982_v59 }
 0xc47   :  { %2038 = vrsqrt.f32 %v984_v60  ;;  %vm1001_vm5 = vweird.f32 %v984_v60 }
 0xc4d   :  { %v2039_v61 = vpop.eup %2038 }
 0xc4e   :  { %v996_v62 = vmul.f32 %v2039_v61, %v984_v60  ;;  %vm1002_vm4 = vweird.f32 %v2039_v61 }
 0xc4f   :  { %vm1003_vm6 = vmor %vm1001_vm5, %vm1002_vm4 }
 0xc50   :  { %v997_v63 = vmul.f32 %v2039_v61, %v996_v62 }
 0xc52   :  { %v998_v2 = vmul.f32 0.5, %v997_v63 }
 0xc54   :  { %v999_v3 = vsub.f32 1.5, %v998_v2 }
 0xc56   :  { %v1000_v4 = vmul.f32 %v2039_v61, %v999_v3 }
 0xc58   :  { %v1004_v5 = vsel %vm1003_vm6, %v2039_v61, %v1000_v4 }
 0xc59   :  { %v1006_v6 = vmul.f32 %v1004_v5, %v972_v51 }
 0xc5b   :  { %v1009_v7 = vmul.f32 %v1007_v43, %v1006_v6 }
 0xc5d   :  { %v1012_v8 = vadd.f32 %v1010_v46, %v1009_v7 }
 0xc5f   :  { %1940 = vmatmul.msk.f32.gmra.mxu0 %vm82_vm0, %v1012_v8 }
 0xc87   :  { %v1045_v9 = vpop.permute.xlu2 %1044 }
 0xc88   :  { %1941 = vmatpush.xpose.msk.msra.mxu3 %vm173_vm8, %v1045_v9 }
 0xc8b   :  { %1942 = vmatmul.msk.f32.vlgmr.msra.gmra.mxu3 %vm173_vm8, %v2478_v55 }
 0xc9e   :  { %v1176_v11 = vpop.permute.xlu0 %1175  ;;  %v1174_v13 = vpop.permute.xlu1 %1173 }
 0xc9f   :  { %1947 = vmatpush.xpose.msk.msrb.mxu3 %vm173_vm8, %v1176_v11 }
 0xca2   :  { %1948 = vmatmul.msk.f32.vlgmr.msrb.gmra.mxu3 %vm173_vm8, %v1174_v13 }
 0xcdc   :  { %v1040_v14 = vpop.f32.mrf.mxu0 }
 0xcdd   :  { %v2493_v15 = vadd.f32 %v1040_v14, %v1013_v58  ;;  %v1924_v58 = vld [vmem:[%s2682_s2 + $0x28] sm:$0xff] }
 0xcde   :  { %1326 = vmatpush.msra.mxu3 %v1924_v58 }
 0xcdf   :  { %1071 = vrot.lane.b32.xlu0 %v2493_v15, %s2163_s19 }
 0xd0e   :  { %v1067_v16 = vpop.f32.mrf.mxu3 }
 0xd0f   :  { %v1097_v17 = vmul.f32 0.17677669, %v1067_v16 }
 0xd11   :  { %v1099_v18 = vsel %vm173_vm8, %v1097_v17, -inf }
 0xd12   :  { %1100 = vmax.xlane.f32.xlu2 %v1099_v18 }
 0xd25   :  { %v1198_v20 = vpop.f32.mrf.mxu3 }
 0xd26   :  { %v1229_v0 = vmul.f32 0.17677669, %v1198_v20 }
 0xd28   :  { %v1231_v21 = vsel %vm173_vm8, %v1229_v0, -inf }
 0xd29   :  { %1232 = vmax.xlane.f32.xlu1 %v1231_v21 }
 0xd2a   :  { %1253 = vrot.lane.b32.xlu2 %v2478_v55, %s2168_s24 }
 0xd42   :  { %1121 = vrot.lane.b32.xlu1 %v2478_v55, %s2166_s22 }
 0xd4a   :  { %1365 = vrot.lane.b32.xlu1 %v2478_v55, %s2171_s29 }
 0xd51   :  { %v1072_v22 = vpop.permute.xlu0 %1071 }
 0xd52   :  { %1943 = vmatpush.xpose.msk.msra.mxu1 %vm173_vm8, %v1072_v22 }
 0xd55   :  { %1944 = vmatmul.msk.f32.vlgmr.msra.gmra.mxu1 %vm173_vm8, %v2493_v15 }
 0xd85   :  { %v1101_v23 = vpop.xlane.xlu2 %1100 }
 0xd86   :  { %v1105_v24 = vsub.f32 %v1097_v17, %v1101_v23 }
 0xd88   :  { %v1107_v27 = vmul.f32 1.442695, %v1105_v24 }
 0xd8a   :  { %2040 = vpow2.f32 %v1107_v27 }
 0xd8d   :  { %v1254_v26 = vpop.permute.xlu2 %1253 }
 0xd90   :  { %v2041_v40 = vpop.eup %2040 }
 0xd91   :  { %v1111_v28 = vsel %vm173_vm8, %v2041_v40, 0.0 }
 0xd92   :  { %1112 = vadd.xlane.f32.xlu0 %v1111_v28 }
 0xd9c   :  { %v1233_v12 = vpop.xlane.xlu1 %1232 }
 0xd9d   :  { %v1237_v25 = vsub.f32 %v1229_v0, %v1233_v12 }
 0xd9f   :  { %v1239_v1 = vmul.f32 1.442695, %v1237_v25 }
 0xda1   :  { %2042 = vpow2.f32 %v1239_v1 }
 0xda6   :  { %1203 = vrot.lane.b32.xlu0 %v2493_v15, %s2164_s20 }
 0xda7   :  { %v2043_v30 = vpop.eup %2042 }
 0xda8   :  { %v1243_v31 = vsel %vm173_vm8, %v2043_v30, 0.0 }
 0xda9   :  { %1244 = vadd.xlane.f32.xlu2 %v1243_v31 }
 0xdae   :  { %1201 = vrot.lane.b32.xlu0 %v2493_v15, %s2165_s21 }
 0xdb4   :  { %v1122_v32 = vpop.permute.xlu1 %1121 }
 0xdb5   :  { %1142 = vmatpush.msrb.mxu2 %v1122_v32 }
 0xdb7   :  { %1274 = vmatpush.msra.mxu2 %v1254_v26  ;;  %v1925_v26 = vld [vmem:[%s2682_s2 + $0x30] sm:$0xff] }
 0xdb8   :  { %1516 = vmatpush.msrb.mxu3 %v1925_v26 }
 0xdbc   :  { %v1366_v38 = vpop.permute.xlu1 %1365 }
 0xdc1   :  { %1363 = vrot.lane.b32.xlu2 %v2478_v55, %s2167_s23 }
 0xdc9   :  { %1147 = vrot.lane.b32.xlu2 %v2493_v15, %s2166_s22 }
 0xdd2   :  { %v1094_v56 = vpop.f32.mrf.mxu1 }
 0xdd3   :  { %v1098_v33 = vmul.f32 0.17677669, %v1094_v56 }
 0xdd5   :  { %v1102_v34 = vsel %vm173_vm8, %v1098_v33, -inf }
 0xdd8   :  { %1103 = vmax.xlane.f32.xlu0 %v1102_v34 }
 0xe05   :  { %v1113_v35 = vpop.xlane.xlu0 %1112 }
 0xe06   :  { %2044 = vrcp.f32 %v1113_v35 }
 0xe0c   :  { %v2045_v36 = vpop.eup %2044 }
 0xe0d   :  { %v1119_v37 = vmul.f32 %v2045_v36, %v2041_v40 }
 0xe0f   :  { %1945 = vmatmul.msk.f32.vlgmr.msrb.gmra.mxu2 %vm173_vm8, %v1119_v37 }
 0xe10   :  { %1957 = vmatpush.xpose.msk.msrb.mxu2 %vm173_vm8, %v1366_v38 }
 0xe18   :  { %v1204_v41 = vpop.permute.xlu0 %1203 }
 0xe19   :  { %1949 = vmatpush.xpose.msk.msrb.mxu1 %vm173_vm8, %v1204_v41 }
 0xe1c   :  { %v1245_v42 = vpop.xlane.xlu2 %1244 }
 0xe1d   :  { %2046 = vrcp.f32 %v1245_v42  ;;  %1355 = vmatpush.msra.mxu1 %v1923_v53 }
 0xe20   :  { %v1202_v43 = vpop.permute.xlu0 %1201 }
 0xe21   :  { %1950 = vmatmul.msk.f32.vlgmr.msrb.gmra.mxu1 %vm173_vm8, %v1202_v43 }
 0xe23   :  { %v2047_v44 = vpop.eup %2046 }
 0xe24   :  { %v1251_v45 = vmul.f32 %v2047_v44, %v2043_v30  ;;  %v1364_v46 = vpop.permute.xlu2 %1363 }
 0xe26   :  { %1951 = vmatmul.msk.f32.vlgmr.msra.gmra.mxu2 %vm173_vm8, %v1251_v45 }
 0xe2c   :  { %v1148_v47 = vpop.permute.xlu2 %1147 }
 0xe2d   :  { %1168 = vmatpush.msrb.mxu0 %v1148_v47 }
 0xe2e   :  { %1958 = vmatmul.msk.f32.vlgmr.msrb.gmra.mxu2 %vm173_vm8, %v1364_v46 }
 0xe4b   :  { %v1104_v48 = vpop.xlane.xlu0 %1103 }
 0xe4c   :  { %v1106_v49 = vsub.f32 %v1098_v33, %v1104_v48 }
 0xe4e   :  { %v1109_v50 = vmul.f32 1.442695, %v1106_v49 }
 0xe50   :  { %2048 = vpow2.f32 %v1109_v50 }
 0xe56   :  { %v2049_v51 = vpop.eup %2048 }
 0xe57   :  { %v1114_v52 = vsel %vm173_vm8, %v2049_v51, 0.0 }
 0xe58   :  { %1115 = vadd.xlane.f32.xlu1 %v1114_v52 }
 0xe71   :  { %1393 = vrot.lane.b32.xlu1 %v2493_v15, %s2171_s29  ;;  %s1867_s29 = sshll.u32 %s2687_s7, 4  ;;  %s1868_s29 = int_to_ptr.hbm [resolvable:$true] %s1867_s29 }
 0xe92   :  { %v1144_v54 = vpop.f32.mrf.mxu2 }
 0xe93   :  { %1955 = vmatmul.msk.f32.vlgmr.msra.gmra.mxu1 %vm173_vm8, %v1144_v54 }
 0xe9e   :  { %v1226_v57 = vpop.f32.mrf.mxu1 }
 0xe9f   :  { %v1230_v59 = vmul.f32 0.17677669, %v1226_v57 }
 0xea1   :  { %v1234_v60 = vsel %vm173_vm8, %v1230_v59, -inf }
 0xea2   :  { %1235 = vmax.xlane.f32.xlu2 %v1234_v60 }
 0xea9   :  { %v1276_v61 = vpop.f32.mrf.mxu2 }
 0xeaa   :  { %1953 = vmatmul.msk.f32.vlgmr.msra.gmra.mxu3 %vm173_vm8, %v1276_v61 }
 0xeb1   :  { %v1388_v62 = vpop.f32.mrf.mxu2 }
 0xeb2   :  { %v1419_v63 = vmul.f32 0.17677669, %v1388_v62 }
 0xeb4   :  { %v1421_v2 = vsel %vm173_vm8, %v1419_v63, -inf }
 0xeb5   :  { %1422 = vmax.xlane.f32.xlu0 %v1421_v2 }
 0xeba   :  { %1391 = vrot.lane.b32.xlu2 %v2493_v15, %s2167_s23 }
 0xec9   :  { %1279 = vrot.lane.b32.xlu0 %v2493_v15, %s2168_s24 }
 0xecb   :  { %v1116_v3 = vpop.xlane.xlu1 %1115 }
 0xecc   :  { %2050 = vrcp.f32 %v1116_v3 }
 0xed1   :  { %1443 = vrot.lane.b32.xlu0 %v2478_v55, %s2173_s12 }
 0xed2   :  { %v2051_v4 = vpop.eup %2050 }
 0xed3   :  { %v1120_v5 = vmul.f32 %v2051_v4, %v2049_v51 }
 0xed5   :  { %1946 = vmatmul.msk.f32.vlgmr.msrb.gmra.mxu0 %vm173_vm8, %v1120_v5 }
 0xed9   :  { %1528 = vrot.lane.b32.xlu0 %v2478_v55, %s2170_s28 }
 0xee1   :  { %1554 = vrot.lane.b32.xlu0 %v2493_v15, %s2169_s27 }
 0xee3   :  { %v1394_v0 = vpop.permute.xlu1 %1393 }
 0xf10   :  { %v2568_v33 = vpop.f32.mrf.mxu1 }
 0xf15   :  { %v1236_v6 = vpop.xlane.xlu2 %1235 }
 0xf16   :  { %v1238_v7 = vsub.f32 %v1230_v59, %v1236_v6 }
 0xf18   :  { %v1241_v8 = vmul.f32 1.442695, %v1238_v7 }
 0xf1a   :  { %2052 = vpow2.f32 %v1241_v8 }
 0xf1d   :  { %v1392_v28 = vpop.permute.xlu2 %1391 }
 0xf20   :  { %v2053_v9 = vpop.eup %2052 }
 0xf21   :  { %v1246_v11 = vsel %vm173_vm8, %v2053_v9, 0.0 }
 0xf22   :  { %1247 = vadd.xlane.f32.xlu1 %v1246_v11 }
 0xf28   :  { %v1423_v13 = vpop.xlane.xlu0 %1422 }
 0xf29   :  { %v1427_v14 = vsub.f32 %v1419_v63, %v1423_v13 }
 0xf2b   :  { %v1429_v16 = vmul.f32 1.442695, %v1427_v14 }
 0xf2d   :  { %2054 = vpow2.f32 %v1429_v16 }
 0xf33   :  { %v2055_v17 = vpop.eup %2054 }
 0xf34   :  { %v1433_v18 = vsel %vm173_vm8, %v2055_v17, 0.0 }
 0xf35   :  { %1434 = vadd.xlane.f32.xlu2 %v1433_v18 }
 0xf3b   :  { %1556 = vrot.lane.b32.xlu1 %v2493_v15, %s2170_s28  ;;  %v1280_v20 = vpop.permute.xlu0 %1279 }
 0xf3c   :  { %1300 = vmatpush.msra.mxu0 %v1280_v20  ;;  %v1328_v20 = vpop.f32.mrf.mxu3 }
 0xf3e   :  { %1959 = vmatpush.xpose.msk.msrb.mxu0 %vm173_vm8, %v1394_v0 }
 0xf43   :  { %v1444_v21 = vpop.permute.xlu0 %1443 }
 0xf44   :  { %1464 = vmatpush.msra.mxu2 %v1444_v21 }
 0xf4b   :  { %v1529_v22 = vpop.permute.xlu0 %1528 }
 0xf4c   :  { %1965 = vmatpush.xpose.msk.msrb.mxu1 %vm173_vm8, %v1529_v22  ;;  %v1358_v22 = vadd.f32 %v2568_v33, %v1328_v20 }
 0xf4d   :  { %1526 = vrot.lane.b32.xlu2 %v2478_v55, %s2169_s27 }
 0xf52   :  { %v1170_v23 = vpop.f32.mrf.mxu0 }
 0xf53   :  { %1956 = vmatmul.msk.f32.gmra.mxu1 %vm173_vm8, %v1170_v23  ;;  %v1555_v32 = vpop.permute.xlu0 %1554 }
 0xf95   :  { %v1248_v24 = vpop.xlane.xlu1 %1247 }
 0xf96   :  { %2056 = vrcp.f32 %v1248_v24  ;;  %v1689_v24 = vperm.slane %v2469_v39, 5 }
 0xf9c   :  { %v2057_v27 = vpop.eup %2056 }
 0xf9d   :  { %v1252_v40 = vmul.f32 %v2057_v27, %v2053_v9 }
 0xf9f   :  { %1952 = vmatmul.msk.f32.vlgmr.msra.gmra.mxu0 %vm173_vm8, %v1252_v40 }
 0xfa7   :  { %1960 = vmatmul.msk.f32.vlgmr.msrb.gmra.mxu0 %vm173_vm8, %v1392_v28 }
 0xfa8   :  { %v1435_v12 = vpop.xlane.xlu2 %1434 }
 0xfa9   :  { %2058 = vrcp.f32 %v1435_v12 }
 0xfad   :  { %v1557_v25 = vpop.permute.xlu1 %1556 }
 0xfae   :  { %1967 = vmatpush.xpose.msk.msrb.mxu2 %vm173_vm8, %v1557_v25 }
 0xfaf   :  { %v2059_v1 = vpop.eup %2058 }
 0xfb0   :  { %v1441_v30 = vmul.f32 %v2059_v1, %v2055_v17  ;;  %v1527_v31 = vpop.permute.xlu2 %1526 }
 0xfb1   :  { %1966 = vmatmul.msk.f32.vlgmr.msrb.gmra.mxu1 %vm173_vm8, %v1527_v31 }
 0xfb2   :  { %1961 = vmatmul.msk.f32.vlgmr.msra.gmra.mxu2 %vm173_vm8, %v1441_v30 }
 0xfba   :  { %1968 = vmatmul.msk.f32.vlgmr.msrb.gmra.mxu2 %vm173_vm8, %v1555_v32 }
 0xfd0   :  { %v2570_v36 = vpop.f32.mrf.mxu1 }
0x101c   :  { %v1302_v56 = vpop.f32.mrf.mxu0 }
0x101d   :  { %1954 = vmatmul.msk.f32.gmra.mxu3 %vm173_vm8, %v1302_v56 }
0x1024   :  { %v1416_v34 = vpop.f32.mrf.mxu0 }
0x1025   :  { %v1420_v35 = vmul.f32 0.17677669, %v1416_v34 }
0x1027   :  { %v1424_v37 = vsel %vm173_vm8, %v1420_v35, -inf }
0x1028   :  { %1425 = vmax.xlane.f32.xlu1 %v1424_v37 }
0x102e   :  { %v1551_v38 = vpop.f32.mrf.mxu1 }
0x102f   :  { %v1582_v41 = vmul.f32 0.17677669, %v1551_v38 }
0x1031   :  { %v1584_v42 = vsel %vm173_vm8, %v1582_v41, -inf }
0x1032   :  { %1585 = vmax.xlane.f32.xlu2 %v1584_v42 }
0x1035   :  { %v1466_v43 = vpop.f32.mrf.mxu2 }
0x1036   :  { %1963 = vmatmul.msk.f32.vlgmr.msrb.gmra.mxu3 %vm173_vm8, %v1466_v43 }
0x103d   :  { %v1579_v44 = vpop.f32.mrf.mxu2 }
0x103e   :  { %v1583_v45 = vmul.f32 0.17677669, %v1579_v44 }
0x1040   :  { %v1587_v46 = vsel %vm173_vm8, %v1583_v45, -inf }
0x1041   :  { %1588 = vmax.xlane.f32.xlu0 %v1587_v46  ;;  %v1929_v46 = vld [vmem:[%s2683_s3 + $0x30] sm:$0xff] }
0x1055   :  { %1469 = vrot.lane.b32.xlu0 %v2493_v15, %s2173_s12 }
0x109b   :  { %v1426_v47 = vpop.xlane.xlu1 %1425 }
0x109c   :  { %v1428_v48 = vsub.f32 %v1420_v35, %v1426_v47  ;;  %v1928_v47 = vld [vmem:[%s2683_s3 + $0x28] sm:$0xff] }
0x109e   :  { %v1431_v49 = vmul.f32 1.442695, %v1428_v48  ;;  %v1927_v48 = vld [vmem:[%s2683_s3 + $0x20] sm:$0xff] }
0x10a0   :  { %2060 = vpow2.f32 %v1431_v49  ;;  %v1331_v0 = vpop.f32.mrf.mxu3 }
0x10a1   :  { %v1361_v30 = vadd.f32 %v2570_v36, %v1331_v0 }
0x10a5   :  { %v1586_v50 = vpop.xlane.xlu2 %1585 }
0x10a6   :  { %v2061_v51 = vpop.eup %2060  ;;  %v1590_v52 = vsub.f32 %v1582_v41, %v1586_v50 }
0x10a7   :  { %v1436_v53 = vsel %vm173_vm8, %v2061_v51, 0.0 }
0x10a8   :  { %v1592_v58 = vmul.f32 1.442695, %v1590_v52  ;;  %1437 = vadd.xlane.f32.xlu1 %v1436_v53 }
0x10aa   :  { %2062 = vpow2.f32 %v1592_v58 }
0x10b0   :  { %v2063_v54 = vpop.eup %2062 }
0x10b1   :  { %v1596_v57 = vsel %vm173_vm8, %v2063_v54, 0.0 }
0x10b2   :  { %1597 = vadd.xlane.f32.xlu2 %v1596_v57 }
0x10b4   :  { %v1589_v59 = vpop.xlane.xlu0 %1588 }
0x10b5   :  { %v1591_v60 = vsub.f32 %v1583_v45, %v1589_v59  ;;  %v1930_v45 = vld [vmem:[%s2683_s3 + $0x38] sm:$0xff] }
0x10b7   :  { %v1594_v61 = vmul.f32 1.442695, %v1591_v60  ;;  %v1738_v60 = vperm.slane %v2469_v39, 2 }
0x10b9   :  { %2064 = vpow2.f32 %v1594_v61  ;;  %v1518_v21 = vpop.f32.mrf.mxu3 }
0x10ba   :  { %v1524_v23 = vadd.f32 %v1518_v21, %v1358_v22 }
0x10bf   :  { %v2065_v62 = vpop.eup %2064 }
0x10c0   :  { %v1599_v63 = vsel %vm173_vm8, %v2065_v62, 0.0 }
0x10c1   :  { %1600 = vadd.xlane.f32.xlu1 %v1599_v63  ;;  %v1741_v63 = vperm.slane %v2469_v39, 3 }
0x10c7   :  { %v1470_v2 = vpop.permute.xlu0 %1469 }
0x10c8   :  { %1490 = vmatpush.msra.mxu0 %v1470_v2 }
0x10ca   :  { %1606 = vrot.lane.b32.xlu2 %v2478_v55, %s2172_s11 }
0x10da   :  { %1632 = vrot.lane.b32.xlu1 %v2493_v15, %s2172_s11  ;;  %v1926_v15 = vld [vmem:[%s2682_s2 + $0x38] sm:$0xff] }
0x10db   :  { %1679 = vmatpush.msra.mxu2 %v1926_v15 }
0x111b   :  { %v1438_v3 = vpop.xlane.xlu1 %1437 }
0x111c   :  { %2066 = vrcp.f32 %v1438_v3 }
0x1122   :  { %v2067_v4 = vpop.eup %2066 }
0x1123   :  { %v1442_v5 = vmul.f32 %v2067_v4, %v2061_v51  ;;  %v1938_v4 = vld [vmem:[%s2684_s4 + $0x78] sm:$0xff] }
0x1124   :  { %1791 = vmatpush.msra.mxu3 %v1938_v4 }
0x1125   :  { %1962 = vmatmul.msk.f32.vlgmr.msra.gmra.mxu0 %vm173_vm8, %v1442_v5  ;;  %v1598_v6 = vpop.xlane.xlu2 %1597  ;;  %v1937_v5 = vld [vmem:[%s2684_s4 + $0x70] sm:$0xff] }
0x1126   :  { %2068 = vrcp.f32 %v1598_v6  ;;  %v1936_v6 = vld [vmem:[%s2684_s4 + $0x68] sm:$0xff]  ;;  %1792 = vmatpush.msra.mxu3 %v1937_v5 }
0x1128   :  { %1793 = vmatpush.msra.mxu3 %v1936_v6 }
0x112c   :  { %v2069_v7 = vpop.eup %2068 }
0x112d   :  { %v1604_v8 = vmul.f32 %v2069_v7, %v2063_v54  ;;  %v1607_v9 = vpop.permute.xlu2 %1606 }
0x112e   :  { %1627 = vmatpush.msrb.mxu0 %v1607_v9  ;;  %v1935_v9 = vld [vmem:[%s2684_s4 + $0x60] sm:$0xff] }
0x112f   :  { %1969 = vmatmul.msk.f32.vlgmr.msrb.gmra.mxu0 %vm173_vm8, %v1604_v8  ;;  %1794 = vmatpush.msra.mxu3 %v1935_v9 }
0x1130   :  { %1763 = vmatpush.msra.mxu0 %v1930_v45 }
0x1132   :  { %1764 = vmatpush.msra.mxu0 %v1929_v46 }
0x1134   :  { %v1601_v11 = vpop.xlane.xlu1 %1600  ;;  %1765 = vmatpush.msra.mxu0 %v1928_v47 }
0x1135   :  { %2070 = vrcp.f32 %v1601_v11 }
0x1136   :  { %1766 = vmatpush.msra.mxu0 %v1927_v48 }
0x113b   :  { %v2071_v55 = vpop.eup %2070 }
0x113c   :  { %v1605_v13 = vmul.f32 %v2071_v55, %v2065_v62  ;;  %v1934_v55 = vld [vmem:[%s2684_s4 + $0x58] sm:$0xff] }
0x113d   :  { %1795 = vmatpush.msra.mxu3 %v1934_v55 }
0x114c   :  { %v1633_v14 = vpop.permute.xlu1 %1632 }
0x114d   :  { %1653 = vmatpush.msra.mxu1 %v1633_v14 }
0x114e   :  { %1970 = vmatmul.msk.f32.vlgmr.msra.gmra.mxu1 %vm173_vm8, %v1605_v13 }
0x11a2   :  { %v1492_v16 = vpop.f32.mrf.mxu0 }
0x11a3   :  { %1964 = vmatmul.msk.f32.gmra.mxu3 %vm173_vm8, %v1492_v16 }
0x11ac   :  { %v1629_v17 = vpop.f32.mrf.mxu0 }
0x11ad   :  { %1971 = vmatmul.msk.f32.vlgmr.msra.gmra.mxu2 %vm173_vm8, %v1629_v17 }
0x11cb   :  { %v1655_v18 = vpop.f32.mrf.mxu1 }
0x11cc   :  { %1972 = vmatmul.msk.f32.gmra.mxu2 %vm173_vm8, %v1655_v18 }
0x1226   :  { %v1521_v1 = vpop.f32.mrf.mxu3 }
0x1227   :  { %v1525_v31 = vadd.f32 %v1521_v1, %v1361_v30 }
0x1230   :  { %v1681_v27 = vpop.f32.mrf.mxu2 }
0x1231   :  { %v1687_v40 = vadd.f32 %v1681_v27, %v1524_v23  ;;  %v1933_v23 = vld [vmem:[%s2684_s4 + $0x50] sm:$0xff]  ;;  %v1931_v27 = vld [vmem:[%s2684_s4 + $0x40] sm:$0xff] }
0x1232   :  { %1796 = vmatpush.msra.mxu3 %v1933_v23 }
0x1233   :  { %v1690_v28 = vadd.f32 %v1689_v24, %v1687_v40  ;;  %v1744_v40 = vperm.slane %v2469_v39, 6 }
0x1235   :  { %v2597_v12 = vadd.f32 %v1690_v28, %v2443_v19 }
0x1237   :  { %v1694_v25 = vsel %vm82_vm0, %v2597_v12, 0.0 }
0x1238   :  { %1695 = vadd.xlane.f32.xlu0 %v1694_v25 }
0x124f   :  { %v1684_v32 = vpop.f32.mrf.mxu2 }
0x1250   :  { %v1688_v26 = vadd.f32 %v1684_v32, %v1525_v31 }
0x1252   :  { %v1691_v56 = vadd.f32 %v1689_v24, %v1688_v26  ;;  %v1932_v24 = vld [vmem:[%s2684_s4 + $0x48] sm:$0xff]  ;;  %v1776_v26 = vperm.slane %v2469_v39, 7 }
0x1253   :  { %1797 = vmatpush.msra.mxu3 %v1932_v24 }
0x1254   :  { %v2603_v33 = vadd.f32 %v1691_v56, %v2452_v29 }
0x1255   :  { %1798 = vmatpush.msra.mxu3 %v1931_v27 }
0x1256   :  { %v1697_v34 = vsel %vm82_vm0, %v2603_v33, 0.0 }
0x1257   :  { %1698 = vadd.xlane.f32.xlu2 %v1697_v34 }
0x12ab   :  { %v1696_v19 = vpop.xlane.xlu0 %1695 }
0x12ac   :  { %v1700_v35 = vmul.f32 %v1696_v19, %v2235_v10 }
0x12ae   :  { %v1702_v37 = vsub.f32 %v2597_v12, %v1700_v35 }
0x12b0   :  { %v1704_v38 = vmul.f32 %v1702_v37, %v1702_v37 }
0x12b2   :  { %v1706_v41 = vsel %vm82_vm0, %v1704_v38, 0.0 }
0x12b3   :  { %1707 = vadd.xlane.f32.xlu1 %v1706_v41 }
0x12ca   :  { %v1699_v36 = vpop.xlane.xlu2 %1698 }
0x12cb   :  { %v1701_v42 = vmul.f32 %v1699_v36, %v2235_v10 }
0x12cd   :  { %v1703_v43 = vsub.f32 %v2603_v33, %v1701_v42 }
0x12cf   :  { %v1705_v29 = vmul.f32 %v1703_v43, %v1703_v43 }
0x12d1   :  { %v1709_v44 = vsel %vm82_vm0, %v1705_v29, 0.0 }
0x12d2   :  { %1710 = vadd.xlane.f32.xlu0 %v1709_v44 }
0x1326   :  { %v1708_v49 = vpop.xlane.xlu1 %1707 }
0x1327   :  { %v1712_v50 = vmul.f32 %v1708_v49, %v2235_v10 }
0x1329   :  { %v1714_v51 = vadd.f32 1e-06, %v1712_v50 }
0x132b   :  { %2072 = vrsqrt.f32 %v1714_v51  ;;  %vm1722_vm8 = vweird.f32 %v1714_v51 }
0x1331   :  { %v2073_v52 = vpop.eup %2072 }
0x1332   :  { %v1717_v53 = vmul.f32 %v2073_v52, %v1714_v51  ;;  %vm1723_vm7 = vweird.f32 %v2073_v52 }
0x1333   :  { %vm1724_vm9 = vmor %vm1722_vm8, %vm1723_vm7 }
0x1334   :  { %v1718_v58 = vmul.f32 %v2073_v52, %v1717_v53 }
0x1336   :  { %v1719_v54 = vmul.f32 0.5, %v1718_v58 }
0x1338   :  { %v1720_v57 = vsub.f32 1.5, %v1719_v54  ;;  %v1808_v54 = vld [vmem:[%s2686_s6] sm:$0x3]  ;;  %s2174_s6 = smov [#allocation7]  }
0x1339   :  { %s1865_s27 = sshll.u32 %s2174_s6, 4  ;;  %s1866_s27 = int_to_ptr.vmem [resolvable:$true] %s1865_s27 }
0x133a   :  { %v1721_v59 = vmul.f32 %v2073_v52, %v1720_v57 }
0x133c   :  { %v1725_v61 = vsel %vm1724_vm9, %v2073_v52, %v1721_v59 }
0x133d   :  { %v1736_v62 = vmul.f32 %v1725_v61, %v1702_v37 }
0x133f   :  { %v1739_v2 = vmul.f32 %v1738_v60, %v1736_v62 }
0x1341   :  { %v1742_v3 = vadd.f32 %v1741_v63, %v1739_v2 }
0x1343   :  { %1973 = vmatmul.msk.f32.vlgmr.msra.gmra.mxu0 %vm82_vm0, %v1742_v3 }
0x1345   :  { %v1711_v7 = vpop.xlane.xlu0 %1710 }
0x1346   :  { %v1713_v8 = vmul.f32 %v1711_v7, %v2235_v10 }
0x1348   :  { %v1715_v11 = vadd.f32 1e-06, %v1713_v8 }
0x134a   :  { %2074 = vrsqrt.f32 %v1715_v11  ;;  %vm1732_vm11 = vweird.f32 %v1715_v11 }
0x1350   :  { %v2075_v13 = vpop.eup %2074 }
0x1351   :  { %v1727_v14 = vmul.f32 %v2075_v13, %v1715_v11  ;;  %vm1733_vm10 = vweird.f32 %v2075_v13 }
0x1352   :  { %vm1734_vm13 = vmor %vm1732_vm11, %vm1733_vm10 }
0x1353   :  { %v1728_v15 = vmul.f32 %v2075_v13, %v1727_v14 }
0x1355   :  { %v1729_v16 = vmul.f32 0.5, %v1728_v15 }
0x1357   :  { %v1730_v17 = vsub.f32 1.5, %v1729_v16 }
0x1359   :  { %v1731_v18 = vmul.f32 %v2075_v13, %v1730_v17 }
0x135b   :  { %v1735_v20 = vsel %vm1734_vm13, %v2075_v13, %v1731_v18 }
0x135c   :  { %v1737_v0 = vmul.f32 %v1735_v20, %v1703_v43 }
0x135e   :  { %v1740_v21 = vmul.f32 %v1738_v60, %v1737_v0  ;;  %v1853_v60 = vperm.slane %v1808_v54, 0 }
0x1360   :  { %v1743_v22 = vadd.f32 %v1741_v63, %v1740_v21  ;;  %v1856_v63 = vperm.slane %v1808_v54, 1 }
0x1362   :  { %1974 = vmatmul.msk.f32.gmra.mxu0 %vm82_vm0, %v1743_v22 }
0x13c0   :  { %v1768_v28 = vpop.f32.mrf.mxu0 }
0x13c1   :  { %v1769_v25 = vadd.f32 %v1768_v28, %v1744_v40 }
0x13c3   :  { %v1774_v1 = vmax.f32 %v1769_v25, 0.0 }
0x13c5   :  { %1975 = vmatmul.msk.f32.vlgmr.msra.gmra.mxu3 %vm905_vm12, %v1774_v1 }
0x13df   :  { %v1771_v30 = vpop.f32.mrf.mxu0 }
0x13e0   :  { %v1772_v31 = vadd.f32 %v1771_v30, %v1744_v40 }
0x13e2   :  { %v1775_v32 = vmax.f32 %v1772_v31, 0.0 }
0x13e4   :  { %1976 = vmatmul.msk.f32.gmra.mxu3 %vm905_vm12, %v1775_v32 }
0x1448   :  { %v1800_v56 = vpop.f32.mrf.mxu3 }
0x1449   :  { %v1801_v34 = vadd.f32 %v1800_v56, %v1776_v26 }
0x144b   :  { %v1806_v19 = vadd.f32 %v1801_v34, %v2597_v12 }
0x144d   :  { %v1809_v35 = vsel %vm82_vm0, %v1806_v19, 0.0 }
0x144e   :  { %1810 = vadd.xlane.f32.xlu0 %v1809_v35 }
0x1467   :  { %v1803_v37 = vpop.f32.mrf.mxu3 }
0x1468   :  { %v1804_v38 = vadd.f32 %v1803_v37, %v1776_v26 }
0x146a   :  { %v1807_v41 = vadd.f32 %v1804_v38, %v2603_v33 }
0x146c   :  { %v1812_v36 = vsel %vm82_vm0, %v1807_v41, 0.0 }
0x146d   :  { %1813 = vadd.xlane.f32.xlu2 %v1812_v36 }
0x14c1   :  { %v1811_v42 = vpop.xlane.xlu0 %1810 }
0x14c2   :  { %v1815_v43 = vmul.f32 %v1811_v42, %v2235_v10 }
0x14c4   :  { %v1817_v29 = vsub.f32 %v1806_v19, %v1815_v43 }
0x14c6   :  { %v1819_v44 = vmul.f32 %v1817_v29, %v1817_v29 }
0x14c8   :  { %v1821_v39 = vsel %vm82_vm0, %v1819_v44, 0.0 }
0x14c9   :  { %1822 = vadd.xlane.f32.xlu1 %v1821_v39 }
0x14e0   :  { %v1814_v45 = vpop.xlane.xlu2 %1813 }
0x14e1   :  { %v1816_v12 = vmul.f32 %v1814_v45, %v2235_v10 }
0x14e3   :  { %v1818_v46 = vsub.f32 %v1807_v41, %v1816_v12 }
0x14e5   :  { %v1820_v47 = vmul.f32 %v1818_v46, %v1818_v46 }
0x14e7   :  { %v1824_v48 = vsel %vm82_vm0, %v1820_v47, 0.0 }
0x14e8   :  { %1825 = vadd.xlane.f32.xlu0 %v1824_v48 }
0x153c   :  { %v1823_v33 = vpop.xlane.xlu1 %1822 }
0x153d   :  { %v1827_v49 = vmul.f32 %v1823_v33, %v2235_v10 }
0x153f   :  { %v1829_v50 = vadd.f32 1e-06, %v1827_v49 }
0x1541   :  { %2076 = vrsqrt.f32 %v1829_v50  ;;  %vm1837_vm14 = vweird.f32 %v1829_v50 }
0x1547   :  { %v2077_v51 = vpop.eup %2076 }
0x1548   :  { %v1832_v52 = vmul.f32 %v2077_v51, %v1829_v50  ;;  %vm1838_vm12 = vweird.f32 %v2077_v51 }
0x1549   :  { %vm1839_vm15 = vmor %vm1837_vm14, %vm1838_vm12 }
0x154a   :  { %v1833_v53 = vmul.f32 %v2077_v51, %v1832_v52 }
0x154c   :  { %v1834_v58 = vmul.f32 0.5, %v1833_v53 }
0x154e   :  { %v1835_v57 = vsub.f32 1.5, %v1834_v58 }
0x1550   :  { %v1836_v59 = vmul.f32 %v2077_v51, %v1835_v57 }
0x1552   :  { %v1840_v61 = vsel %vm1839_vm15, %v2077_v51, %v1836_v59 }
0x1553   :  { %v1851_v62 = vmul.f32 %v1840_v61, %v1817_v29 }
0x1555   :  { %v1854_v2 = vmul.f32 %v1853_v60, %v1851_v62 }
0x1557   :  { %v1857_v3 = vadd.f32 %v1856_v63, %v1854_v2 }
0x1559   :  { %1859 = vst.msk [vmem:[#allocation7] sm:$0xff] %vm82_vm0, %v1857_v3 }
0x155b   :  { %v1826_v4 = vpop.xlane.xlu0 %1825 }
0x155c   :  { %v1828_v5 = vmul.f32 %v1826_v4, %v2235_v10 }
0x155e   :  { %v1830_v6 = vadd.f32 1e-06, %v1828_v5 }
0x1560   :  { %2078 = vrsqrt.f32 %v1830_v6  ;;  %vm1847_vm2 = vweird.f32 %v1830_v6 }
0x1566   :  { %v2079_v7 = vpop.eup %2078 }
0x1567   :  { %v1842_v8 = vmul.f32 %v2079_v7, %v1830_v6  ;;  %vm1848_vm1 = vweird.f32 %v2079_v7 }
0x1568   :  { %vm1849_vm3 = vmor %vm1847_vm2, %vm1848_vm1 }
0x1569   :  { %v1843_v9 = vmul.f32 %v2079_v7, %v1842_v8 }
0x156b   :  { %v1844_v11 = vmul.f32 0.5, %v1843_v9 }
0x156d   :  { %v1845_v55 = vsub.f32 1.5, %v1844_v11 }
0x156f   :  { %v1846_v13 = vmul.f32 %v2079_v7, %v1845_v55 }
0x1571   :  { %v1850_v14 = vsel %vm1849_vm3, %v2079_v7, %v1846_v13 }
0x1572   :  { %v1852_v15 = vmul.f32 %v1850_v14, %v1818_v46 }
0x1574   :  { %v1855_v10 = vmul.f32 %v1853_v60, %v1852_v15 }
0x1576   :  { %v1858_v16 = vadd.f32 %v1856_v63, %v1855_v10 }
0x1578   :  { %1860 = vst.msk [vmem:[#allocation7 + $0x8] sm:$0xff] %vm82_vm0, %v1858_v16 }
0x1579   :  { %1873 = dma.vmem_to_hbm [thread:$0]  %s1866_s27, 256, %s1868_s29, [#allocation4], %s2159_s9, %s2159_s9, %s2160_s10  }
0x157a   :  { %2156 = dma.done.wait [#allocation4], 256  }
0x157b   :  { %2157 = vsyncadd [#allocation4], 4294967040 }
0x157c   :  { %1878 = vsyncpa [#allocation3], 1 }
0x157d   :  { %1879 = vsyncpa [#allocation6], 1 }
0x157e   :  { %1880 = vsyncpa [#allocation4], 1 }

</bundles_post_ra>
